<compile_context>
chip_gen: v7x
topology: tpu7x:2x2x1
jax: 0.10.0
libtpu: 0.0.40
codegen_flags: <defaults>
</compile_context>

<pallas_src>
import math
from functools import partial

import jax
import jax.numpy as jnp
from jax.experimental import pallas as pl
from jax.experimental.pallas import tpu as pltpu

# ------------------------- config (small, consistent with module) ----------
B = 2              # batch
T = 16             # tokens per sample (num_frames * patches, flattened)
FEATURE_DIM = 48   # backbone feature dim (feature_dim arg)
HIDDEN = 32        # transformer.d_model
NUM_QUERIES = 9    # num_queries (>1 => n_decode = 1, query_index unused)
NUM_CLASSES = 5    # class_embed -> num_classes + 1 = 6
NUM_DEC_LAYERS = 2 # decoder layers of the injected transformer stand-in
CLIP_DIM = 512     # obj_proj / img_proj output dim (hardcoded 512 in module)
LANE = 128         # TPU lane width: head outputs padded to this for full-lane stores


# ------------------------------ fused kernel --------------------------------
def _fused_obj_decoder_kernel(
    feat_ref,                 # (B*T, F)        raw features, flattened
    q0_ref,                   # (QP, D)         query_embed padded to QP sublane rows
    wkv_ref,                  # (F, 2*L*D)      proj folded into per-layer [k|v] weights
    wqo_ref,                  # (2L, D, D)      [wq_0, wo_0, wq_1, wo_1, ...]
    wheads_ref,               # (D, 256+2*clip) [class(pad128) | mlp1(pad128) | obj | img]
    ball_ref,                 # (3, 256+2*clip) row0 = head biases, row1 = b2, row2 = b3
    wmlp_ref,                 # (2, 128, 128)   bbox MLP layers 2 & 3, zero-padded
    logits_ref,               # out (B, Q-1, 128)
    boxes_ref,                # out (B, Q-1, 128)
    img_ref,                  # out (B, 1, clip)
    obj_ref,                  # out (B, Q-1, clip)
    *, B, T, Q, QP, D, L, clip, scale):
    f32 = jnp.float32

    def mm(a, b):                        # a @ b on the MXU, f32 accumulate
        return jnp.dot(a, b, preferred_element_type=f32)

    def mm_t(a, b):                      # a @ b.T without materializing the transpose
        return jax.lax.dot_general(a, b, (((1,), (1,)), ((), ())),
                                   preferred_element_type=f32)

    # ---- K/V for ALL layers in one lane-dense matmul (proj_w folded in) ----
    feat = feat_ref[...].astype(f32)                       # (B*T, F)
    kv_all = mm(feat, wkv_ref[...])                        # (B*T, 2*L*D)

    # ---- decoder state: one (B*QP, D) buffer, queries padded to QP rows ----
    q0 = q0_ref[...].astype(f32)                           # (QP, D)
    x = jnp.concatenate([q0] * B, axis=0)                  # (B*QP, D)

    # ---- transformer stand-in: L cross-attention decoder layers (unrolled) -
    for l in range(L):
        wq = wqo_ref[2 * l]                                # (D, D)
        wo = wqo_ref[2 * l + 1]                            # (D, D)
        qp = mm(x, wq)                                     # (B*QP, D) batched q-proj
        a_parts = []
        for b in range(B):
            k = kv_all[b * T:(b + 1) * T, 2 * l * D:(2 * l + 1) * D]        # (T, D)
            v = kv_all[b * T:(b + 1) * T, (2 * l + 1) * D:(2 * l + 2) * D]  # (T, D)
            s = mm_t(qp[b * QP:(b + 1) * QP, :], k) * scale                 # (QP, T)
            s = s - jnp.max(s, axis=-1, keepdims=True)
            p = jnp.exp(s)
            p = p * pl.reciprocal(jnp.sum(p, axis=-1, keepdims=True), approx=True)
            a_parts.append(mm(p, v))                                        # (QP, D)
        a = jnp.concatenate(a_parts, axis=0)               # (B*QP, D)
        x = x + mm(a, wo)                                  # batched out-proj + residual

    # ---- heads + CLIP projections: ONE wide fused matmul on hs[-1] ---------
    # columns: [0:128) class logits | [128:256) bbox MLP hidden-1 | [256:256+clip) obj | [.. :] img
    ball = ball_ref[...]                                   # (3, 256+2*clip)
    y = mm(x, wheads_ref[...]) + ball[0:1, :]              # (B*QP, 256+2*clip)

    # bbox MLP layers 2 & 3 (128-lane padded; padding columns are exact zeros)
    h = jnp.maximum(y[:, 128:256], 0.0)                    # relu(l1) — bias already in y
    h = jnp.maximum(mm(h, wmlp_ref[0]) + ball[1:2, :128], 0.0)
    boxes = jax.nn.sigmoid(mm(h, wmlp_ref[1]) + ball[2:3, :128])            # (B*QP, 128)

    o_obj = 256
    o_img = 256 + clip
    # NOTE: Q-1 == 8 here, so every cond slice / store below is (8,128)-tile
    # aligned; if Q changes to a non 8k+1 value these become masked stores
    # (correct but slower).  TODO(synk): pad+mask cond rows for arbitrary Q.
    for b in range(B):
        r0 = b * QP
        logits_ref[b] = y[r0:r0 + Q - 1, 0:128]                     # class_embed(cond_hs[-1])
        boxes_ref[b] = boxes[r0:r0 + Q - 1, :]                      # bbox_embed(...).sigmoid()
        obj_ref[b] = y[r0:r0 + Q - 1, o_obj:o_obj + clip]           # hs[-1][:, :-1] @ obj_proj
        img_ref[b] = y[r0 + Q - 1:r0 + Q, o_img:o_img + clip]       # hs[-1][:, -1]  @ img_proj


# ------------------------------ forward -------------------------------------
def obj_decoder_forward(features, packed, *, num_queries=NUM_QUERIES,
                        num_classes=NUM_CLASSES):
    """Mirrors ObjDecoder.forward (aux_loss=False). One fused Pallas kernel."""
    Bf, Tf, F = features.shape
    QP, D = packed["q0"].shape
    L = packed["w_qo"].shape[0] // 2
    clip = (packed["w_heads"].shape[1] - 2 * LANE) // 2
    Q = num_queries
    C1 = num_classes + 1

    kernel = partial(_fused_obj_decoder_kernel,
                     B=Bf, T=Tf, Q=Q, QP=QP, D=D, L=L, clip=clip,
                     scale=1.0 / math.sqrt(D))

    vmem_spec = pl.BlockSpec(memory_space=pltpu.MemorySpace.VMEM)  # whole array, VMEM-resident
    logits_p, boxes_p, img_p, obj_embeds = pl.pallas_call(
        kernel,
        out_shape=(
            jax.ShapeDtypeStruct((Bf, Q - 1, LANE), jnp.float32),
            jax.ShapeDtypeStruct((Bf, Q - 1, LANE), jnp.float32),
            jax.ShapeDtypeStruct((Bf, 1, clip), jnp.float32),
            jax.ShapeDtypeStruct((Bf, Q - 1, clip), jnp.float32),
        ),
        in_specs=[vmem_spec] * 7,
        out_specs=(vmem_spec, vmem_spec, vmem_spec, vmem_spec),
    )(
        features.reshape(Bf * Tf, F).astype(jnp.float32),
        packed["q0"], packed["w_kv"], packed["w_qo"],
        packed["w_heads"], packed["b_all"], packed["w_mlp"],
    )

    out = {"pred_logits": logits_p[..., :C1],   # slice away lane padding (free)
           "pred_boxes": boxes_p[..., :4]}
    img_embed = img_p[:, 0, :]                  # (B, 512)
    return out, img_embed, obj_embeds


# --------------------- one-time parameter packing / fusion -------------------
def pack_params(raw):
    """Runs ONCE at setup: fold proj into K/V weights, pad head weights to
    128 output lanes, concatenate everything into 7 kernel inputs."""
    proj_w = raw["proj_w"]                      # (F, D)
    wq, wk = raw["tfm"]["wq"], raw["tfm"]["wk"]
    wv, wo = raw["tfm"]["wv"], raw["tfm"]["wo"]
    L = wq.shape[0]
    D = proj_w.shape[1]
    Q = raw["query_embed"].shape[0]
    QP = ((Q + 7) // 8) * 8                     # pad queries to sublane multiple
    heads = raw["heads"]

    pad_cols = lambda w, n: jnp.pad(w, ((0, 0), (0, n - w.shape[1])))

    # K/V weights with the input projection folded in: (F, L*2D)
    w_kv = jnp.concatenate(
        [jnp.concatenate([proj_w @ wk[l], proj_w @ wv[l]], axis=1) for l in range(L)],
        axis=1)

    # interleaved [wq_0, wo_0, wq_1, wo_1, ...]: (2L, D, D)
    w_qo = jnp.stack([m for l in range(L) for m in (wq[l], wo[l])])

    # fused head weight: [class(pad128) | bbox-l1(pad128) | obj_proj | img_proj]
    w_heads = jnp.concatenate(
        [pad_cols(heads["wc"], LANE), pad_cols(heads["w1"], LANE),
         raw["obj_proj"], raw["img_proj"]], axis=1)        # (D, 256 + 2*clip)
    total = w_heads.shape[1]
    b_all = jnp.stack([
        jnp.concatenate([pad_cols(heads["bc"], LANE), pad_cols(heads["b1"], LANE),
                         jnp.zeros((1, total - 2 * LANE), jnp.float32)], axis=1)[0],
        pad_cols(heads["b2"], total)[0],
        pad_cols(heads["b3"], total)[0],
    ])                                                     # (3, 256 + 2*clip)

    # bbox MLP layers 2 & 3, zero-padded to (128, 128)
    w_mlp = jnp.stack([
        jnp.pad(heads["w2"], ((0, LANE - D), (0, LANE - D))),
        jnp.pad(heads["w3"], ((0, LANE - D), (0, LANE - heads["w3"].shape[1]))),
    ])                                                     # (2, 128, 128)

    # query embedding padded to QP rows (padded rows never reach the outputs)
    q0 = jnp.pad(raw["query_embed"], ((0, QP - Q), (0, 0)))

    return {"q0": q0, "w_kv": w_kv, "w_qo": w_qo,
            "w_heads": w_heads, "b_all": b_all, "w_mlp": w_mlp}


# --------------------------- deterministic init ------------------------------
def init_params(key):
    ks = list(jax.random.split(key, 16 + 4 * NUM_DEC_LAYERS))
    nk = lambda: ks.pop()

    def lin_w(k, fan_in, fan_out):
        return jax.random.normal(k, (fan_in, fan_out), jnp.float32) / math.sqrt(fan_in)

    stack = lambda f: jnp.stack([f() for _ in range(NUM_DEC_LAYERS)])
    params = {
        "proj_w": lin_w(nk(), FEATURE_DIM, HIDDEN),                  # Linear(feature_dim, D, bias=False)
        "query_embed": jax.random.normal(nk(), (NUM_QUERIES, HIDDEN), jnp.float32),
        "img_proj": jax.random.normal(nk(), (HIDDEN, CLIP_DIM), jnp.float32) * HIDDEN ** -0.5,
        "obj_proj": jax.random.normal(nk(), (HIDDEN, CLIP_DIM), jnp.float32) * HIDDEN ** -0.5,
        "heads": {
            # class_embed: Linear(D, num_classes + 1)
            "wc": lin_w(nk(), HIDDEN, NUM_CLASSES + 1),
            "bc": jnp.zeros((1, NUM_CLASSES + 1), jnp.float32),
            # bbox_embed: MLP(D, D, 4, 3 layers)
            "w1": lin_w(nk(), HIDDEN, HIDDEN), "b1": jnp.zeros((1, HIDDEN), jnp.float32),
            "w2": lin_w(nk(), HIDDEN, HIDDEN), "b2": jnp.zeros((1, HIDDEN), jnp.float32),
            "w3": lin_w(nk(), HIDDEN, 4),      "b3": jnp.zeros((1, 4), jnp.float32),
        },
        "tfm": {"wq": stack(lambda: lin_w(nk(), HIDDEN, HIDDEN)),
                "wk": stack(lambda: lin_w(nk(), HIDDEN, HIDDEN)),
                "wv": stack(lambda: lin_w(nk(), HIDDEN, HIDDEN)),
                "wo": stack(lambda: lin_w(nk(), HIDDEN, HIDDEN))},
    }
    return params


if __name__ == "__main__":
    key = jax.random.PRNGKey(0)
    pkey, xkey = jax.random.split(key)
    raw_params = init_params(pkey)
    packed = jax.tree_util.tree_map(jax.block_until_ready, pack_params(raw_params))  # one-time
    features = jax.random.normal(xkey, (B, T, FEATURE_DIM), jnp.float32)

    fwd = jax.jit(obj_decoder_forward)
    out, img_embed, obj_embeds = fwd(features, packed)
    jax.block_until_ready((out, img_embed, obj_embeds))

    assert out["pred_logits"].shape == (B, NUM_QUERIES - 1, NUM_CLASSES + 1)
    assert out["pred_boxes"].shape == (B, NUM_QUERIES - 1, 4)
    assert img_embed.shape == (B, CLIP_DIM)
    assert obj_embeds.shape == (B, NUM_QUERIES - 1, CLIP_DIM)
    assert bool(jnp.all(jnp.isfinite(out["pred_logits"])))
    assert bool(jnp.all(jnp.isfinite(img_embed))) and bool(jnp.all(jnp.isfinite(obj_embeds)))
    assert bool(jnp.all((out["pred_boxes"] >= 0.0) & (out["pred_boxes"] <= 1.0)))

    print("KERNEL_OK")
</pallas_src>

<mosaic_0001>
module attributes {stable_mosaic.version = 11 : i64} {
  func.func @_fused_obj_decoder_kernel(%arg0: memref<32x48xf32, #tpu.memory_space<vmem>>, %arg1: memref<16x32xf32, #tpu.memory_space<vmem>>, %arg2: memref<48x128xf32, #tpu.memory_space<vmem>>, %arg3: memref<4x32x32xf32, #tpu.memory_space<vmem>>, %arg4: memref<32x1280xf32, #tpu.memory_space<vmem>>, %arg5: memref<3x1280xf32, #tpu.memory_space<vmem>>, %arg6: memref<2x128x128xf32, #tpu.memory_space<vmem>>, %arg7: memref<2x8x128xf32, #tpu.memory_space<vmem>>, %arg8: memref<2x8x128xf32, #tpu.memory_space<vmem>>, %arg9: memref<2x1x512xf32, #tpu.memory_space<vmem>>, %arg10: memref<2x8x512xf32, #tpu.memory_space<vmem>>) attributes {dimension_semantics = [], scalar_prefetch = 0 : i64, scratch_operands = 0 : i64, tpu.core_type = #tpu.core_type<tc>} {
    %c0 = arith.constant 0 : index
    %c0_0 = arith.constant 0 : index
    %0 = vector.load %arg0[%c0, %c0_0] : memref<32x48xf32, #tpu.memory_space<vmem>>, vector<32x48xf32>
    %c0_1 = arith.constant 0 : index
    %c0_2 = arith.constant 0 : index
    %1 = vector.load %arg2[%c0_1, %c0_2] : memref<48x128xf32, #tpu.memory_space<vmem>>, vector<48x128xf32>
    %cst = arith.constant dense<0.000000e+00> : vector<32x128xf32>
    %2 = tpu.matmul %0, %1, %cst {dimension_numbers = #tpu.dot_dimension_numbers<[1], [0], [0], [1], [0, 0, 1, 1], [], []>} : vector<32x48xf32>, vector<48x128xf32>, vector<32x128xf32> -> vector<32x128xf32>
    %c0_3 = arith.constant 0 : index
    %c0_4 = arith.constant 0 : index
    %3 = vector.load %arg1[%c0_3, %c0_4] : memref<16x32xf32, #tpu.memory_space<vmem>>, vector<16x32xf32>
    %4 = tpu.concatenate %3, %3 in 0 : vector<16x32xf32>, vector<16x32xf32> -> vector<32x32xf32>
    %c0_5 = arith.constant 0 : index
    %c0_6 = arith.constant 0 : index
    %c0_7 = arith.constant 0 : index
    %5 = vector.load %arg3[%c0_5, %c0_6, %c0_7] : memref<4x32x32xf32, #tpu.memory_space<vmem>>, vector<1x32x32xf32>
    %6 = vector.shape_cast %5 : vector<1x32x32xf32> to vector<32x32xf32>
    %c1 = arith.constant 1 : index
    %c0_8 = arith.constant 0 : index
    %c0_9 = arith.constant 0 : index
    %7 = vector.load %arg3[%c1, %c0_8, %c0_9] : memref<4x32x32xf32, #tpu.memory_space<vmem>>, vector<1x32x32xf32>
    %8 = vector.shape_cast %7 : vector<1x32x32xf32> to vector<32x32xf32>
    %cst_10 = arith.constant dense<0.000000e+00> : vector<32x32xf32>
    %9 = tpu.matmul %4, %6, %cst_10 {dimension_numbers = #tpu.dot_dimension_numbers<[1], [0], [0], [1], [0, 0, 1, 1], [], []>} : vector<32x32xf32>, vector<32x32xf32>, vector<32x32xf32> -> vector<32x32xf32>
    %10 = vector.extract_strided_slice %2 {offsets = [0, 0], sizes = [16, 32], strides = [1, 1]} : vector<32x128xf32> to vector<16x32xf32>
    %11 = vector.extract_strided_slice %2 {offsets = [0, 32], sizes = [16, 32], strides = [1, 1]} : vector<32x128xf32> to vector<16x32xf32>
    %12 = vector.extract_strided_slice %9 {offsets = [0, 0], sizes = [16, 32], strides = [1, 1]} : vector<32x32xf32> to vector<16x32xf32>
    %cst_11 = arith.constant dense<0.000000e+00> : vector<16x16xf32>
    %13 = tpu.matmul %12, %10, %cst_11 {dimension_numbers = #tpu.dot_dimension_numbers<[1], [1], [0], [0], [0, 0, 1, 0], [], []>} : vector<16x32xf32>, vector<16x32xf32>, vector<16x16xf32> -> vector<16x16xf32>
    %cst_12 = arith.constant 0.176776692 : f32
    %14 = vector.broadcast %cst_12 : f32 to vector<16x16xf32>
    %15 = arith.mulf %13, %14 : vector<16x16xf32>
    %cst_13 = arith.constant dense<0xFF800000> : vector<16xf32>
    %16 = vector.multi_reduction <maximumf>, %15, %cst_13 [1] : vector<16x16xf32> to vector<16xf32>
    %17 = vector.shape_cast %16 : vector<16xf32> to vector<16x1xf32>
    %18 = vector.broadcast %17 : vector<16x1xf32> to vector<16x16xf32>
    %19 = arith.subf %15, %18 : vector<16x16xf32>
    %20 = math.exp %19 : vector<16x16xf32>
    %cst_14 = arith.constant dense<0.000000e+00> : vector<16xf32>
    %21 = vector.multi_reduction <add>, %20, %cst_14 [1] : vector<16x16xf32> to vector<16xf32>
    %22 = vector.shape_cast %21 : vector<16xf32> to vector<16x1xf32>
    %23 = tpu.reciprocal %22 {approx = true} : vector<16x1xf32> -> vector<16x1xf32>
    %24 = vector.broadcast %23 : vector<16x1xf32> to vector<16x16xf32>
    %25 = arith.mulf %20, %24 : vector<16x16xf32>
    %cst_15 = arith.constant dense<0.000000e+00> : vector<16x32xf32>
    %26 = tpu.matmul %25, %11, %cst_15 {dimension_numbers = #tpu.dot_dimension_numbers<[1], [0], [0], [1], [0, 0, 1, 1], [], []>} : vector<16x16xf32>, vector<16x32xf32>, vector<16x32xf32> -> vector<16x32xf32>
    %27 = vector.extract_strided_slice %2 {offsets = [16, 0], sizes = [16, 32], strides = [1, 1]} : vector<32x128xf32> to vector<16x32xf32>
    %28 = vector.extract_strided_slice %2 {offsets = [16, 32], sizes = [16, 32], strides = [1, 1]} : vector<32x128xf32> to vector<16x32xf32>
    %29 = vector.extract_strided_slice %9 {offsets = [16, 0], sizes = [16, 32], strides = [1, 1]} : vector<32x32xf32> to vector<16x32xf32>
    %cst_16 = arith.constant dense<0.000000e+00> : vector<16x16xf32>
    %30 = tpu.matmul %29, %27, %cst_16 {dimension_numbers = #tpu.dot_dimension_numbers<[1], [1], [0], [0], [0, 0, 1, 0], [], []>} : vector<16x32xf32>, vector<16x32xf32>, vector<16x16xf32> -> vector<16x16xf32>
    %cst_17 = arith.constant 0.176776692 : f32
    %31 = vector.broadcast %cst_17 : f32 to vector<16x16xf32>
    %32 = arith.mulf %30, %31 : vector<16x16xf32>
    %cst_18 = arith.constant dense<0xFF800000> : vector<16xf32>
    %33 = vector.multi_reduction <maximumf>, %32, %cst_18 [1] : vector<16x16xf32> to vector<16xf32>
    %34 = vector.shape_cast %33 : vector<16xf32> to vector<16x1xf32>
    %35 = vector.broadcast %34 : vector<16x1xf32> to vector<16x16xf32>
    %36 = arith.subf %32, %35 : vector<16x16xf32>
    %37 = math.exp %36 : vector<16x16xf32>
    %cst_19 = arith.constant dense<0.000000e+00> : vector<16xf32>
    %38 = vector.multi_reduction <add>, %37, %cst_19 [1] : vector<16x16xf32> to vector<16xf32>
    %39 = vector.shape_cast %38 : vector<16xf32> to vector<16x1xf32>
    %40 = tpu.reciprocal %39 {approx = true} : vector<16x1xf32> -> vector<16x1xf32>
    %41 = vector.broadcast %40 : vector<16x1xf32> to vector<16x16xf32>
    %42 = arith.mulf %37, %41 : vector<16x16xf32>
    %cst_20 = arith.constant dense<0.000000e+00> : vector<16x32xf32>
    %43 = tpu.matmul %42, %28, %cst_20 {dimension_numbers = #tpu.dot_dimension_numbers<[1], [0], [0], [1], [0, 0, 1, 1], [], []>} : vector<16x16xf32>, vector<16x32xf32>, vector<16x32xf32> -> vector<16x32xf32>
    %44 = tpu.concatenate %26, %43 in 0 : vector<16x32xf32>, vector<16x32xf32> -> vector<32x32xf32>
    %cst_21 = arith.constant dense<0.000000e+00> : vector<32x32xf32>
    %45 = tpu.matmul %44, %8, %cst_21 {dimension_numbers = #tpu.dot_dimension_numbers<[1], [0], [0], [1], [0, 0, 1, 1], [], []>} : vector<32x32xf32>, vector<32x32xf32>, vector<32x32xf32> -> vector<32x32xf32>
    %46 = arith.addf %4, %45 : vector<32x32xf32>
    %c2 = arith.constant 2 : index
    %c0_22 = arith.constant 0 : index
    %c0_23 = arith.constant 0 : index
    %47 = vector.load %arg3[%c2, %c0_22, %c0_23] : memref<4x32x32xf32, #tpu.memory_space<vmem>>, vector<1x32x32xf32>
    %48 = vector.shape_cast %47 : vector<1x32x32xf32> to vector<32x32xf32>
    %c3 = arith.constant 3 : index
    %c0_24 = arith.constant 0 : index
    %c0_25 = arith.constant 0 : index
    %49 = vector.load %arg3[%c3, %c0_24, %c0_25] : memref<4x32x32xf32, #tpu.memory_space<vmem>>, vector<1x32x32xf32>
    %50 = vector.shape_cast %49 : vector<1x32x32xf32> to vector<32x32xf32>
    %cst_26 = arith.constant dense<0.000000e+00> : vector<32x32xf32>
    %51 = tpu.matmul %46, %48, %cst_26 {dimension_numbers = #tpu.dot_dimension_numbers<[1], [0], [0], [1], [0, 0, 1, 1], [], []>} : vector<32x32xf32>, vector<32x32xf32>, vector<32x32xf32> -> vector<32x32xf32>
    %52 = vector.extract_strided_slice %2 {offsets = [0, 64], sizes = [16, 32], strides = [1, 1]} : vector<32x128xf32> to vector<16x32xf32>
    %53 = vector.extract_strided_slice %2 {offsets = [0, 96], sizes = [16, 32], strides = [1, 1]} : vector<32x128xf32> to vector<16x32xf32>
    %54 = vector.extract_strided_slice %51 {offsets = [0, 0], sizes = [16, 32], strides = [1, 1]} : vector<32x32xf32> to vector<16x32xf32>
    %cst_27 = arith.constant dense<0.000000e+00> : vector<16x16xf32>
    %55 = tpu.matmul %54, %52, %cst_27 {dimension_numbers = #tpu.dot_dimension_numbers<[1], [1], [0], [0], [0, 0, 1, 0], [], []>} : vector<16x32xf32>, vector<16x32xf32>, vector<16x16xf32> -> vector<16x16xf32>
    %cst_28 = arith.constant 0.176776692 : f32
    %56 = vector.broadcast %cst_28 : f32 to vector<16x16xf32>
    %57 = arith.mulf %55, %56 : vector<16x16xf32>
    %cst_29 = arith.constant dense<0xFF800000> : vector<16xf32>
    %58 = vector.multi_reduction <maximumf>, %57, %cst_29 [1] : vector<16x16xf32> to vector<16xf32>
    %59 = vector.shape_cast %58 : vector<16xf32> to vector<16x1xf32>
    %60 = vector.broadcast %59 : vector<16x1xf32> to vector<16x16xf32>
    %61 = arith.subf %57, %60 : vector<16x16xf32>
    %62 = math.exp %61 : vector<16x16xf32>
    %cst_30 = arith.constant dense<0.000000e+00> : vector<16xf32>
    %63 = vector.multi_reduction <add>, %62, %cst_30 [1] : vector<16x16xf32> to vector<16xf32>
    %64 = vector.shape_cast %63 : vector<16xf32> to vector<16x1xf32>
    %65 = tpu.reciprocal %64 {approx = true} : vector<16x1xf32> -> vector<16x1xf32>
    %66 = vector.broadcast %65 : vector<16x1xf32> to vector<16x16xf32>
    %67 = arith.mulf %62, %66 : vector<16x16xf32>
    %cst_31 = arith.constant dense<0.000000e+00> : vector<16x32xf32>
    %68 = tpu.matmul %67, %53, %cst_31 {dimension_numbers = #tpu.dot_dimension_numbers<[1], [0], [0], [1], [0, 0, 1, 1], [], []>} : vector<16x16xf32>, vector<16x32xf32>, vector<16x32xf32> -> vector<16x32xf32>
    %69 = vector.extract_strided_slice %2 {offsets = [16, 64], sizes = [16, 32], strides = [1, 1]} : vector<32x128xf32> to vector<16x32xf32>
    %70 = vector.extract_strided_slice %2 {offsets = [16, 96], sizes = [16, 32], strides = [1, 1]} : vector<32x128xf32> to vector<16x32xf32>
    %71 = vector.extract_strided_slice %51 {offsets = [16, 0], sizes = [16, 32], strides = [1, 1]} : vector<32x32xf32> to vector<16x32xf32>
    %cst_32 = arith.constant dense<0.000000e+00> : vector<16x16xf32>
    %72 = tpu.matmul %71, %69, %cst_32 {dimension_numbers = #tpu.dot_dimension_numbers<[1], [1], [0], [0], [0, 0, 1, 0], [], []>} : vector<16x32xf32>, vector<16x32xf32>, vector<16x16xf32> -> vector<16x16xf32>
    %cst_33 = arith.constant 0.176776692 : f32
    %73 = vector.broadcast %cst_33 : f32 to vector<16x16xf32>
    %74 = arith.mulf %72, %73 : vector<16x16xf32>
    %cst_34 = arith.constant dense<0xFF800000> : vector<16xf32>
    %75 = vector.multi_reduction <maximumf>, %74, %cst_34 [1] : vector<16x16xf32> to vector<16xf32>
    %76 = vector.shape_cast %75 : vector<16xf32> to vector<16x1xf32>
    %77 = vector.broadcast %76 : vector<16x1xf32> to vector<16x16xf32>
    %78 = arith.subf %74, %77 : vector<16x16xf32>
    %79 = math.exp %78 : vector<16x16xf32>
    %cst_35 = arith.constant dense<0.000000e+00> : vector<16xf32>
    %80 = vector.multi_reduction <add>, %79, %cst_35 [1] : vector<16x16xf32> to vector<16xf32>
    %81 = vector.shape_cast %80 : vector<16xf32> to vector<16x1xf32>
    %82 = tpu.reciprocal %81 {approx = true} : vector<16x1xf32> -> vector<16x1xf32>
    %83 = vector.broadcast %82 : vector<16x1xf32> to vector<16x16xf32>
    %84 = arith.mulf %79, %83 : vector<16x16xf32>
    %cst_36 = arith.constant dense<0.000000e+00> : vector<16x32xf32>
    %85 = tpu.matmul %84, %70, %cst_36 {dimension_numbers = #tpu.dot_dimension_numbers<[1], [0], [0], [1], [0, 0, 1, 1], [], []>} : vector<16x16xf32>, vector<16x32xf32>, vector<16x32xf32> -> vector<16x32xf32>
    %86 = tpu.concatenate %68, %85 in 0 : vector<16x32xf32>, vector<16x32xf32> -> vector<32x32xf32>
    %cst_37 = arith.constant dense<0.000000e+00> : vector<32x32xf32>
    %87 = tpu.matmul %86, %50, %cst_37 {dimension_numbers = #tpu.dot_dimension_numbers<[1], [0], [0], [1], [0, 0, 1, 1], [], []>} : vector<32x32xf32>, vector<32x32xf32>, vector<32x32xf32> -> vector<32x32xf32>
    %88 = arith.addf %46, %87 : vector<32x32xf32>
    %c0_38 = arith.constant 0 : index
    %c0_39 = arith.constant 0 : index
    %89 = vector.load %arg5[%c0_38, %c0_39] : memref<3x1280xf32, #tpu.memory_space<vmem>>, vector<3x1280xf32>
    %c0_40 = arith.constant 0 : index
    %c0_41 = arith.constant 0 : index
    %90 = vector.load %arg4[%c0_40, %c0_41] : memref<32x1280xf32, #tpu.memory_space<vmem>>, vector<32x1280xf32>
    %cst_42 = arith.constant dense<0.000000e+00> : vector<32x1280xf32>
    %91 = tpu.matmul %88, %90, %cst_42 {dimension_numbers = #tpu.dot_dimension_numbers<[1], [0], [0], [1], [0, 0, 1, 1], [], []>} : vector<32x32xf32>, vector<32x1280xf32>, vector<32x1280xf32> -> vector<32x1280xf32>
    %92 = vector.extract_strided_slice %89 {offsets = [0, 0], sizes = [1, 1280], strides = [1, 1]} : vector<3x1280xf32> to vector<1x1280xf32>
    %93 = vector.broadcast %92 : vector<1x1280xf32> to vector<32x1280xf32>
    %94 = arith.addf %91, %93 : vector<32x1280xf32>
    %95 = vector.extract_strided_slice %94 {offsets = [0, 128], sizes = [32, 128], strides = [1, 1]} : vector<32x1280xf32> to vector<32x128xf32>
    %cst_43 = arith.constant 0.000000e+00 : f32
    %96 = vector.broadcast %cst_43 : f32 to vector<32x128xf32>
    %97 = arith.maximumf %95, %96 : vector<32x128xf32>
    %c0_44 = arith.constant 0 : index
    %c0_45 = arith.constant 0 : index
    %c0_46 = arith.constant 0 : index
    %98 = vector.load %arg6[%c0_44, %c0_45, %c0_46] : memref<2x128x128xf32, #tpu.memory_space<vmem>>, vector<1x128x128xf32>
    %99 = vector.shape_cast %98 : vector<1x128x128xf32> to vector<128x128xf32>
    %cst_47 = arith.constant dense<0.000000e+00> : vector<32x128xf32>
    %100 = tpu.matmul %97, %99, %cst_47 {dimension_numbers = #tpu.dot_dimension_numbers<[1], [0], [0], [1], [0, 0, 1, 1], [], []>} : vector<32x128xf32>, vector<128x128xf32>, vector<32x128xf32> -> vector<32x128xf32>
    %101 = vector.extract_strided_slice %89 {offsets = [1, 0], sizes = [1, 128], strides = [1, 1]} : vector<3x1280xf32> to vector<1x128xf32>
    %102 = vector.broadcast %101 : vector<1x128xf32> to vector<32x128xf32>
    %103 = arith.addf %100, %102 : vector<32x128xf32>
    %cst_48 = arith.constant 0.000000e+00 : f32
    %104 = vector.broadcast %cst_48 : f32 to vector<32x128xf32>
    %105 = arith.maximumf %103, %104 : vector<32x128xf32>
    %c1_49 = arith.constant 1 : index
    %c0_50 = arith.constant 0 : index
    %c0_51 = arith.constant 0 : index
    %106 = vector.load %arg6[%c1_49, %c0_50, %c0_51] : memref<2x128x128xf32, #tpu.memory_space<vmem>>, vector<1x128x128xf32>
    %107 = vector.shape_cast %106 : vector<1x128x128xf32> to vector<128x128xf32>
    %cst_52 = arith.constant dense<0.000000e+00> : vector<32x128xf32>
    %108 = tpu.matmul %105, %107, %cst_52 {dimension_numbers = #tpu.dot_dimension_numbers<[1], [0], [0], [1], [0, 0, 1, 1], [], []>} : vector<32x128xf32>, vector<128x128xf32>, vector<32x128xf32> -> vector<32x128xf32>
    %109 = vector.extract_strided_slice %89 {offsets = [2, 0], sizes = [1, 128], strides = [1, 1]} : vector<3x1280xf32> to vector<1x128xf32>
    %110 = vector.broadcast %109 : vector<1x128xf32> to vector<32x128xf32>
    %111 = arith.addf %108, %110 : vector<32x128xf32>
    %112 = arith.negf %111 : vector<32x128xf32>
    %113 = math.exp %112 : vector<32x128xf32>
    %cst_53 = arith.constant 1.000000e+00 : f32
    %114 = vector.broadcast %cst_53 : f32 to vector<32x128xf32>
    %115 = arith.addf %114, %113 : vector<32x128xf32>
    %116 = arith.divf %114, %115 : vector<32x128xf32>
    %117 = vector.extract_strided_slice %94 {offsets = [0, 0], sizes = [8, 128], strides = [1, 1]} : vector<32x1280xf32> to vector<8x128xf32>
    %c0_54 = arith.constant 0 : index
    %c0_55 = arith.constant 0 : index
    %c0_56 = arith.constant 0 : index
    %118 = vector.load %arg7[%c0_54, %c0_55, %c0_56] : memref<2x8x128xf32, #tpu.memory_space<vmem>>, vector<1x8x128xf32>
    %119 = vector.shape_cast %118 : vector<1x8x128xf32> to vector<8x128xf32>
    %120 = vector.shape_cast %117 : vector<8x128xf32> to vector<1x8x128xf32>
    tpu.vector_store %arg7[%c0_54, %c0_55, %c0_56], %120 {strides = array<i32>} : memref<2x8x128xf32, #tpu.memory_space<vmem>>, vector<1x8x128xf32>,
    %121 = vector.extract_strided_slice %116 {offsets = [0, 0], sizes = [8, 128], strides = [1, 1]} : vector<32x128xf32> to vector<8x128xf32>
    %c0_57 = arith.constant 0 : index
    %c0_58 = arith.constant 0 : index
    %c0_59 = arith.constant 0 : index
    %122 = vector.load %arg8[%c0_57, %c0_58, %c0_59] : memref<2x8x128xf32, #tpu.memory_space<vmem>>, vector<1x8x128xf32>
    %123 = vector.shape_cast %122 : vector<1x8x128xf32> to vector<8x128xf32>
    %124 = vector.shape_cast %121 : vector<8x128xf32> to vector<1x8x128xf32>
    tpu.vector_store %arg8[%c0_57, %c0_58, %c0_59], %124 {strides = array<i32>} : memref<2x8x128xf32, #tpu.memory_space<vmem>>, vector<1x8x128xf32>,
    %125 = vector.extract_strided_slice %94 {offsets = [0, 256], sizes = [8, 512], strides = [1, 1]} : vector<32x1280xf32> to vector<8x512xf32>
    %c0_60 = arith.constant 0 : index
    %c0_61 = arith.constant 0 : index
    %c0_62 = arith.constant 0 : index
    %126 = vector.load %arg10[%c0_60, %c0_61, %c0_62] : memref<2x8x512xf32, #tpu.memory_space<vmem>>, vector<1x8x512xf32>
    %127 = vector.shape_cast %126 : vector<1x8x512xf32> to vector<8x512xf32>
    %128 = vector.shape_cast %125 : vector<8x512xf32> to vector<1x8x512xf32>
    tpu.vector_store %arg10[%c0_60, %c0_61, %c0_62], %128 {strides = array<i32>} : memref<2x8x512xf32, #tpu.memory_space<vmem>>, vector<1x8x512xf32>,
    %129 = vector.extract_strided_slice %94 {offsets = [8, 768], sizes = [1, 512], strides = [1, 1]} : vector<32x1280xf32> to vector<1x512xf32>
    %c0_63 = arith.constant 0 : index
    %c0_64 = arith.constant 0 : index
    %c0_65 = arith.constant 0 : index
    %130 = vector.load %arg9[%c0_63, %c0_64, %c0_65] : memref<2x1x512xf32, #tpu.memory_space<vmem>>, vector<1x1x512xf32>
    %131 = vector.shape_cast %130 : vector<1x1x512xf32> to vector<1x512xf32>
    %132 = vector.shape_cast %129 : vector<1x512xf32> to vector<1x1x512xf32>
    tpu.vector_store %arg9[%c0_63, %c0_64, %c0_65], %132 {strides = array<i32>} : memref<2x1x512xf32, #tpu.memory_space<vmem>>, vector<1x1x512xf32>,
    %133 = vector.extract_strided_slice %94 {offsets = [16, 0], sizes = [8, 128], strides = [1, 1]} : vector<32x1280xf32> to vector<8x128xf32>
    %c1_66 = arith.constant 1 : index
    %c0_67 = arith.constant 0 : index
    %c0_68 = arith.constant 0 : index
    %134 = vector.load %arg7[%c1_66, %c0_67, %c0_68] : memref<2x8x128xf32, #tpu.memory_space<vmem>>, vector<1x8x128xf32>
    %135 = vector.shape_cast %134 : vector<1x8x128xf32> to vector<8x128xf32>
    %136 = vector.shape_cast %133 : vector<8x128xf32> to vector<1x8x128xf32>
    tpu.vector_store %arg7[%c1_66, %c0_67, %c0_68], %136 {strides = array<i32>} : memref<2x8x128xf32, #tpu.memory_space<vmem>>, vector<1x8x128xf32>,
    %137 = vector.extract_strided_slice %116 {offsets = [16, 0], sizes = [8, 128], strides = [1, 1]} : vector<32x128xf32> to vector<8x128xf32>
    %c1_69 = arith.constant 1 : index
    %c0_70 = arith.constant 0 : index
    %c0_71 = arith.constant 0 : index
    %138 = vector.load %arg8[%c1_69, %c0_70, %c0_71] : memref<2x8x128xf32, #tpu.memory_space<vmem>>, vector<1x8x128xf32>
    %139 = vector.shape_cast %138 : vector<1x8x128xf32> to vector<8x128xf32>
    %140 = vector.shape_cast %137 : vector<8x128xf32> to vector<1x8x128xf32>
    tpu.vector_store %arg8[%c1_69, %c0_70, %c0_71], %140 {strides = array<i32>} : memref<2x8x128xf32, #tpu.memory_space<vmem>>, vector<1x8x128xf32>,
    %141 = vector.extract_strided_slice %94 {offsets = [16, 256], sizes = [8, 512], strides = [1, 1]} : vector<32x1280xf32> to vector<8x512xf32>
    %c1_72 = arith.constant 1 : index
    %c0_73 = arith.constant 0 : index
    %c0_74 = arith.constant 0 : index
    %142 = vector.load %arg10[%c1_72, %c0_73, %c0_74] : memref<2x8x512xf32, #tpu.memory_space<vmem>>, vector<1x8x512xf32>
    %143 = vector.shape_cast %142 : vector<1x8x512xf32> to vector<8x512xf32>
    %144 = vector.shape_cast %141 : vector<8x512xf32> to vector<1x8x512xf32>
    tpu.vector_store %arg10[%c1_72, %c0_73, %c0_74], %144 {strides = array<i32>} : memref<2x8x512xf32, #tpu.memory_space<vmem>>, vector<1x8x512xf32>,
    %145 = vector.extract_strided_slice %94 {offsets = [24, 768], sizes = [1, 512], strides = [1, 1]} : vector<32x1280xf32> to vector<1x512xf32>
    %c1_75 = arith.constant 1 : index
    %c0_76 = arith.constant 0 : index
    %c0_77 = arith.constant 0 : index
    %146 = vector.load %arg9[%c1_75, %c0_76, %c0_77] : memref<2x1x512xf32, #tpu.memory_space<vmem>>, vector<1x1x512xf32>
    %147 = vector.shape_cast %146 : vector<1x1x512xf32> to vector<1x512xf32>
    %148 = vector.shape_cast %145 : vector<1x512xf32> to vector<1x1x512xf32>
    tpu.vector_store %arg9[%c1_75, %c0_76, %c0_77], %148 {strides = array<i32>} : memref<2x1x512xf32, #tpu.memory_space<vmem>>, vector<1x1x512xf32>,
    return
  }
}

</mosaic_0001>

<bundles_post_ra>
// kernel: obj_decoder_forward.1
= control target key start
LH: loop header
LB: loop body
LE: loop exit
PB: predicated region body
PF: predicated region fallthrough
CT: control target
= control target key end

     0   :  { %16 = vsyncpa [#allocation3], 0  ;;  %s3657_s0 = inlined_call_operand.hbm [shape: f32[32,48], index: 0, kind: input, shape index: {}]   ;;  %s3658_s1 = inlined_call_operand.hbm [shape: f32[16,32], index: 1, kind: input, shape index: {}]   ;;  %s3659_s2 = inlined_call_operand.hbm [shape: f32[48,128], index: 2, kind: input, shape index: {}]   ;;  %s3660_s3 = inlined_call_operand.hbm [shape: f32[4,32,32], index: 3, kind: input, shape index: {}]   ;;  %s3661_s4 = inlined_call_operand.hbm [shape: f32[32,1280], index: 4, kind: input, shape index: {}]   ;;  %s3662_s5 = inlined_call_operand.hbm [shape: f32[3,1280], index: 5, kind: input, shape index: {}]   ;;  %s3663_s6 = inlined_call_operand.hbm [shape: f32[2,128,128], index: 6, kind: input, shape index: {}]   ;;  %s3664_s7 = inlined_call_operand.vmem [shape: f32[2,8,128], index: 7, kind: output, shape index: {0}]   ;;  %s3665_s8 = inlined_call_operand.vmem [shape: f32[2,8,128], index: 8, kind: output, shape index: {1}]   ;;  %s3666_s9 = inlined_call_operand.vmem [shape: f32[2,1,512], index: 9, kind: output, shape index: {2}]   ;;  %s3667_s10 = inlined_call_operand.hbm [shape: f32[2,8,512], index: 10, kind: output, shape index: {3}]  }
   0x1   :  { %17 = vsyncpa [#allocation6], 0 }
   0x2   :  { %18 = vsyncpa [#allocation9], 0 }
   0x3   :  { %19 = vsyncpa [#allocation12], 0 }
   0x4   :  { %20 = vsyncpa [#allocation4], 0  ;;  %s3212_s13 = smov [#allocation5]   ;;  %s3213_s15 = smov [#allocation8]  }
   0x5   :  { %s38_s14 = sshll.u32 %s3212_s13, 4  ;;  %s62_s16 = sshll.u32 %s3213_s15, 4  ;;  %s39_s14 = int_to_ptr.vmem [resolvable:$true] %s38_s14  ;;  %s3285_s16 = int_to_ptr.vmem [resolvable:$true] %s62_s16 }
   0x6   :  { %s3026_s19 = scalar_lea.hbm %s3658_s1, 256 }
   0x7   :  { %p3027_p0 = scmp.ne.s32.totalorder %s3658_s1, %s3026_s19  ;;  %p3030_p1 = scmp.lt.u32.totalorder %s3026_s19, %s3658_s1 }
   0x9   :  { %p3032_p2 = pnand %p3030_p1, %p3027_p0 }
   0xb   :  { %3035 = shalt.err (!%p3032_p2)
}
   0xc   :  { %s3036_s24 = scalar_lea.vmem %s39_s14, 256  ;;  %p3041_p4 = scmp.lt.s32.totalorder %s39_s14, %s39_s14 }
   0xd   :  { %p3037_p3 = scmp.ne.s32.totalorder %s39_s14, %s3036_s24  ;;  %p3042_p5 = scmp.lt.s32.totalorder %s3036_s24, %s3036_s24 }
   0xf   :  { %p3043_p6 = por %p3042_p5, %p3041_p4 }
  0x11   :  { %p3044_p7 = pnand %p3043_p6, %p3037_p3 }
  0x13   :  { %3047 = shalt.err (!%p3044_p7)
}
  0x14   :  { %s3214_s25 = smov 128   ;;  %s3215_s26 = smov 8  }
  0x15   :  { %44 = dma.hbm_to_vmem [thread:$0]  %s3658_s1, 256, %s39_s14, [#allocation6], %s3214_s25, %s3214_s25, %s3215_s26  }
  0x16   :  { %s3048_s11 = scalar_lea.hbm %s3660_s3, 2048 }
  0x17   :  { %p3049_p8 = scmp.ne.s32.totalorder %s3660_s3, %s3048_s11  ;;  %p3052_p9 = scmp.lt.u32.totalorder %s3048_s11, %s3660_s3 }
  0x19   :  { %p3054_p10 = pnand %p3052_p9, %p3049_p8 }
  0x1b   :  { %3057 = shalt.err (!%p3054_p10)
}
  0x1c   :  { %s3058_s18 = scalar_lea.vmem %s3285_s16, 2048  ;;  %p3063_p12 = scmp.lt.s32.totalorder %s3285_s16, %s3285_s16 }
  0x1d   :  { %p3059_p11 = scmp.ne.s32.totalorder %s3285_s16, %s3058_s18  ;;  %p3064_p13 = scmp.lt.s32.totalorder %s3058_s18, %s3058_s18 }
  0x1f   :  { %p3065_p0 = por %p3064_p13, %p3063_p12 }
  0x21   :  { %p3066_p1 = pnand %p3065_p0, %p3059_p11 }
  0x23   :  { %3069 = shalt.err (!%p3066_p1)
}
  0x24   :  { %68 = dma.hbm_to_vmem [thread:$0]  %s3660_s3, 2048, %s3285_s16, [#allocation9], %s3214_s25, %s3214_s25, %s3215_s26  }
  0x25   :  { %s3216_s19 = smov [#allocation11]   ;;  %s3217_s21 = smov [#allocation2]  }
  0x26   :  { %s87_s20 = sshll.u32 %s3216_s19, 4  ;;  %s26_s22 = sshll.u32 %s3217_s21, 4  ;;  %s88_s20 = int_to_ptr.vmem [resolvable:$true] %s87_s20  ;;  %s3322_s22 = int_to_ptr.vmem [resolvable:$true] %s26_s22 }
  0x27   :  { %s3070_s27 = scalar_lea.hbm %s3662_s5, 640 }
  0x28   :  { %p3071_p2 = scmp.ne.s32.totalorder %s3662_s5, %s3070_s27  ;;  %p3074_p3 = scmp.lt.u32.totalorder %s3070_s27, %s3662_s5 }
  0x2a   :  { %p3076_p4 = pnand %p3074_p3, %p3071_p2 }
  0x2c   :  { %3079 = shalt.err (!%p3076_p4)
}
  0x2d   :  { %s3080_s3 = scalar_lea.vmem %s88_s20, 640  ;;  %p3085_p6 = scmp.lt.s32.totalorder %s88_s20, %s88_s20 }
  0x2e   :  { %p3081_p5 = scmp.ne.s32.totalorder %s88_s20, %s3080_s3  ;;  %p3086_p7 = scmp.lt.s32.totalorder %s3080_s3, %s3080_s3 }
  0x30   :  { %p3087_p8 = por %p3086_p7, %p3085_p6 }
  0x32   :  { %p3088_p9 = pnand %p3087_p8, %p3081_p5 }
  0x34   :  { %3091 = shalt.err (!%p3088_p9)
}
  0x35   :  { %90 = dma.hbm_to_vmem [thread:$0]  %s3662_s5, 640, %s88_s20, [#allocation12]  }
  0x36   :  { %s3092_s17 = scalar_lea.hbm %s3657_s0, 512 }
  0x37   :  { %p3093_p10 = scmp.ne.s32.totalorder %s3657_s0, %s3092_s17  ;;  %p3096_p11 = scmp.lt.u32.totalorder %s3092_s17, %s3657_s0 }
  0x39   :  { %p3098_p12 = pnand %p3096_p11, %p3093_p10 }
  0x3b   :  { %3101 = shalt.err (!%p3098_p12)
}
  0x3c   :  { %s3102_s21 = scalar_lea.vmem %s3322_s22, 512  ;;  %p3107_p0 = scmp.lt.s32.totalorder %s3322_s22, %s3322_s22 }
  0x3d   :  { %p3103_p13 = scmp.ne.s32.totalorder %s3322_s22, %s3102_s21  ;;  %p3108_p1 = scmp.lt.s32.totalorder %s3102_s21, %s3102_s21 }
  0x3f   :  { %p3109_p2 = por %p3108_p1, %p3107_p0 }
  0x41   :  { %p3110_p3 = pnand %p3109_p2, %p3103_p13 }
  0x43   :  { %3113 = shalt.err (!%p3110_p3)
}
  0x44   :  { %32 = dma.hbm_to_vmem [thread:$0]  %s3657_s0, 512, %s3322_s22, [#allocation3], %s3214_s25, %s3214_s25, %s3215_s26  }
  0x45   :  { %s3218_s23 = smov [#allocation7]   ;;  %s3219_s27 = smov [#allocation10]  }
  0x46   :  { %s50_s24 = sshll.u32 %s3218_s23, 4  ;;  %s74_s28 = sshll.u32 %s3219_s27, 4  ;;  %s51_s24 = int_to_ptr.vmem [resolvable:$true] %s50_s24  ;;  %s3356_s28 = int_to_ptr.vmem [resolvable:$true] %s74_s28 }
  0x47   :  { %s3114_s11 = scalar_lea.hbm %s3659_s2, 768 }
  0x48   :  { %p3115_p4 = scmp.ne.s32.totalorder %s3659_s2, %s3114_s11  ;;  %p3118_p5 = scmp.lt.u32.totalorder %s3114_s11, %s3659_s2 }
  0x4a   :  { %p3120_p6 = pnand %p3118_p5, %p3115_p4 }
  0x4c   :  { %3123 = shalt.err (!%p3120_p6)
}
  0x4d   :  { %s3124_s0 = scalar_lea.vmem %s51_s24, 768  ;;  %p3129_p8 = scmp.lt.s32.totalorder %s51_s24, %s51_s24 }
  0x4e   :  { %p3125_p7 = scmp.ne.s32.totalorder %s51_s24, %s3124_s0  ;;  %p3130_p9 = scmp.lt.s32.totalorder %s3124_s0, %s3124_s0 }
  0x50   :  { %p3131_p10 = por %p3130_p9, %p3129_p8 }
  0x52   :  { %p3132_p11 = pnand %p3131_p10, %p3125_p7 }
  0x54   :  { %3135 = shalt.err (!%p3132_p11)
}
  0x55   :  { %56 = dma.hbm_to_vmem [thread:$0]  %s3659_s2, 768, %s51_s24, [#allocation6], %s3214_s25, %s3214_s25, %s3215_s26  }
  0x56   :  { %s3136_s1 = scalar_lea.hbm %s3661_s4, 5120 }
  0x57   :  { %p3137_p12 = scmp.ne.s32.totalorder %s3661_s4, %s3136_s1  ;;  %p3140_p13 = scmp.lt.u32.totalorder %s3136_s1, %s3661_s4 }
  0x59   :  { %p3142_p0 = pnand %p3140_p13, %p3137_p12 }
  0x5b   :  { %3145 = shalt.err (!%p3142_p0)
}
  0x5c   :  { %s3146_s20 = scalar_lea.vmem %s3356_s28, 5120  ;;  %p3151_p2 = scmp.lt.s32.totalorder %s3356_s28, %s3356_s28 }
  0x5d   :  { %p3147_p1 = scmp.ne.s32.totalorder %s3356_s28, %s3146_s20  ;;  %p3152_p3 = scmp.lt.s32.totalorder %s3146_s20, %s3146_s20 }
  0x5f   :  { %p3153_p4 = por %p3152_p3, %p3151_p2 }
  0x61   :  { %p3154_p5 = pnand %p3153_p4, %p3147_p1 }
  0x63   :  { %3157 = shalt.err (!%p3154_p5)
}
  0x64   :  { %s3220_s2 = smov 1280   ;;  %s3221_s23 = smov 80  }
  0x65   :  { %80 = dma.hbm_to_vmem [thread:$0]  %s3661_s4, 5120, %s3356_s28, [#allocation9], %s3220_s2, %s3220_s2, %s3221_s23  }
  0x66   :  { %s3222_s29 = smov [#allocation13]   ;;  %s3158_s16 = scalar_lea.hbm %s3663_s6, 4096 }
  0x67   :  { %s96_s30 = sshll.u32 %s3222_s29, 4  ;;  %p3159_p6 = scmp.ne.s32.totalorder %s3663_s6, %s3158_s16  ;;  %s97_s30 = int_to_ptr.vmem [resolvable:$true] %s96_s30 }
  0x68   :  { %p3162_p7 = scmp.lt.u32.totalorder %s3158_s16, %s3663_s6 }
  0x6a   :  { %p3164_p8 = pnand %p3162_p7, %p3159_p6 }
  0x6c   :  { %3167 = shalt.err (!%p3164_p8)
}
  0x6d   :  { %s3168_s15 = scalar_lea.vmem %s97_s30, 4096  ;;  %p3173_p10 = scmp.lt.s32.totalorder %s97_s30, %s97_s30 }
  0x6e   :  { %p3169_p9 = scmp.ne.s32.totalorder %s97_s30, %s3168_s15  ;;  %p3174_p11 = scmp.lt.s32.totalorder %s3168_s15, %s3168_s15 }
  0x70   :  { %p3175_p12 = por %p3174_p11, %p3173_p10 }
  0x72   :  { %p3176_p13 = pnand %p3175_p12, %p3169_p9 }
  0x74   :  { %3179 = shalt.err (!%p3176_p13)
}
  0x75   :  { %102 = dma.hbm_to_vmem [thread:$0]  %s3663_s6, 4096, %s97_s30, [#allocation12], %s3214_s25, %s3214_s25, %s3215_s26  }
  0x76   :  { %3202 = dma.done.wait [#allocation3], 512  }
  0x77   :  { %3203 = vsyncadd [#allocation3], 4294966784 }
  0x78   :  { %3204 = dma.done.wait [#allocation6], 1024  }
  0x79   :  { %3205 = vsyncadd [#allocation6], 4294966272 }
  0x7a   :  { %3206 = dma.done.wait [#allocation9], 7168  }
  0x7b   :  { %3207 = vsyncadd [#allocation9], 4294960128 }
  0x7c   :  { %3208 = dma.done.wait [#allocation12], 4736  }
  0x7d   :  { %3209 = vsyncadd [#allocation12], 4294962560  ;;  %v128_v0 = vld [vmem:[#allocation7] sm:$0xff]  ;;  %v129_v1 = vld [vmem:[#allocation7 + $0x8] sm:$0xff]  ;;  %vm134_vm0 = vcmask 392192   ;;  %vm243_vm1 = vcmask 261120  }
  0x7e   :  { %v130_v2 = vld [vmem:[#allocation7 + $0x10] sm:$0xff]  ;;  %v2750_v3 = vpack.c.bf16 %v129_v1, %v128_v0  ;;  %v131_v4 = vld [vmem:[#allocation7 + $0x18] sm:$0xff]  ;;  %v132_v5 = vld [vmem:[#allocation7 + $0x20] sm:$0xff]  ;;  %vm424_vm3 = vcmask 130048   ;;  %s3223_s6 = smov 96   ;;  %s3224_s25 = smov 64  }
  0x7f   :  { %v2754_v6 = vpack.c.bf16 %v131_v4, %v130_v2  ;;  %v133_v7 = vld [vmem:[#allocation7 + $0x28] sm:$0xff]  ;;  %v124_v8 = vld [vmem:[#allocation2] sm:$0xff]  ;;  %v235_v10 = vld [vmem:[#allocation8 + $0x8] sm:$0xff]  ;;  %s3225_s26 = smov 32  }
  0x80   :  { %v234_v9 = vld [vmem:[#allocation8] sm:$0xff]  ;;  %2751 = vmatprep.subr.bf16.mxu0 %v2750_v3  ;;  %2556 = vmatprep.mubr.msk.f32.mxu0 %vm134_vm0, %v124_v8  ;;  %v236_v11 = vld [vmem:[#allocation8 + $0x10] sm:$0xff]  ;;  %v237_v12 = vld [vmem:[#allocation8 + $0x18] sm:$0xff]  ;;  %v2758_v16 = vpack.c.bf16 %v133_v7, %v132_v5 }
  0x81   :  { %2753 = vmatpush3.bf16.msra.mxu0 %v2750_v3  ;;  %v2762_v13 = vpack.c.bf16 %v235_v10, %v234_v9  ;;  %v2766_v14 = vpack.c.bf16 %v237_v12, %v236_v11  ;;  %v3406_v15 = vld [vmem:[#allocation5] sm:$0xff]  ;;  %v3410_v17 = vld [vmem:[#allocation5 + $0x8] sm:$0xff]  ;;  %v126_v19 = vld [vmem:[#allocation2 + $0x10] sm:$0xff] }
  0x82   :  { %2755 = vmatprep.subr.bf16.mxu0 %v2754_v6  ;;  %2570 = vmatprep.mubr.msk.f32.mxu1 %vm243_vm1, %v3406_v15  ;;  %v125_v18 = vld [vmem:[#allocation2 + $0x8] sm:$0xff]  ;;  %v127_v20 = vld [vmem:[#allocation2 + $0x18] sm:$0xff]  ;;  %vm3423_vm2 = vmpackc.low %vm243_vm1, %vm243_vm1 }
  0x83   :  { %2763 = vmatprep.subr.bf16.mxu1 %v2762_v13  ;;  %v834_v2 = vld [vmem:[#allocation8 + $0x40] sm:$0xff]  ;;  %v835_v3 = vld [vmem:[#allocation8 + $0x48] sm:$0xff]  ;;  %v836_v5 = vld [vmem:[#allocation8 + $0x50] sm:$0xff] }
  0x84   :  { %2765 = vmatpush3.bf16.msra.mxu1 %v2762_v13  ;;  %v2798_v4 = vpack.c.bf16 %v835_v3, %v834_v2 }
  0x85   :  { %2757 = vmatpush3.bf16.msra.mxu0 %v2754_v6  ;;  %2767 = vmatprep.subr.bf16.mxu1 %v2766_v14  ;;  %v837_v6 = vld [vmem:[#allocation8 + $0x58] sm:$0xff] }
  0x86   :  { %2759 = vmatprep.subr.bf16.mxu0 %v2758_v16  ;;  %v2802_v7 = vpack.c.bf16 %v837_v6, %v836_v5 }
  0x88   :  { %2769 = vmatpush3.bf16.msra.mxu1 %v2766_v14 }
  0x89   :  { %2761 = vmatpush3.bf16.msra.mxu0 %v2758_v16 }
  0x8b   :  { %2571 = vmatmul.mubr.msk.f32.vlgmr.msra.gmra.mrb[0].mxu1 %vm243_vm1, %v3410_v17 }
  0x8c   :  { %2557 = vmatmul.mubr.msk.f32.vlgmr.msra.gmra.mrb[0].mxu0 %vm134_vm0, %v125_v18  ;;  %2573 = vmatprep.mubr.msk.f32.mxu1 %vm243_vm1, %v3406_v15 }
  0x8d   :  { %2559 = vmatprep.mubr.msk.f32.mxu0 %vm134_vm0, %v126_v19 }
  0x8f   :  { %2574 = vmatmul.mubr.msk.f32.gmra.mrb[2].mxu1 %vm243_vm1, %v3410_v17 }
  0x90   :  { %2560 = vmatmul.mubr.msk.f32.gmra.mrb[2].mxu0 %vm134_vm0, %v127_v20 }
 0x15e   :  { %v2572_v21 = vpop.f32.mrb[0].mxu1 }
 0x15f   :  { %v2558_v22 = vpop.f32.mrb[0].mxu0  ;;  %v316_v23 = vpop.f32.mrb[1].mxu1 }
 0x160   :  { %v213_v24 = vpop.f32.mrb[1].mxu0  ;;  %2580 = vmatprep.mubr.msk.f32.mxu1 %vm243_vm1, %v316_v23  ;;  %v240_v23 = vld [vmem:[#allocation8 + $0x28] sm:$0xff] }
 0x161   :  { %v2770_v26 = vpack.c.bf16 %v2558_v22, %v213_v24  ;;  %v3428_v27 = vpack.i.bf16 %v2558_v22, %v213_v24  ;;  %v239_v22 = vld [vmem:[#allocation8 + $0x20] sm:$0xff] }
 0x162   :  { %v2575_v28 = vpop.f32.mrb[2].mxu1 }
 0x163   :  { %2772 = vmatprep.subr.msk.bf16.mxu1 %vm3423_vm2, %v2770_v26  ;;  %v2561_v29 = vpop.f32.mrb[2].mxu0  ;;  %v326_v30 = vpop.f32.mrb[3].mxu1 }
 0x164   :  { %2775 = vmatpush3.bf16.xpose.msk.msra.mxu1 %vm3423_vm2, %v2770_v26  ;;  %v223_v31 = vpop.f32.mrb[3].mxu0 }
 0x165   :  { %v2780_v32 = vpack.c.bf16 %v2561_v29, %v223_v31  ;;  %v3434_v33 = vpack.i.bf16 %v2561_v29, %v223_v31  ;;  %v2790_v31 = vpack.c.bf16 %v240_v23, %v239_v22 }
 0x167   :  { %2782 = vmatprep.subr.msk.bf16.mxu1 %vm3423_vm2, %v2780_v32 }
 0x16b   :  { %2581 = vmatmul.mubr.msk.f32.vlgmr.msra.gmra.mrb[4].mxu1 %vm243_vm1, %v2572_v21 }
 0x16c   :  { %2785 = vmatpush3.bf16.xpose.msk.msra.mxu1 %vm3423_vm2, %v2780_v32  ;;  %2594 = vmatprep.mubr.msk.f32.mxu1 %vm243_vm1, %v326_v30 }
 0x16d   :  { %2799 = vmatprep.subr.bf16.mxu1 %v2798_v4 }
 0x173   :  { %2595 = vmatmul.mubr.msk.f32.vlgmr.msra.gmra.mrb[6].mxu1 %vm243_vm1, %v2575_v28 }
 0x174   :  { %2801 = vmatpush3.bf16.msra.mxu1 %v2798_v4 }
 0x175   :  { %2803 = vmatprep.subr.bf16.mxu1 %v2802_v7 }
 0x178   :  { %2805 = vmatpush3.bf16.msra.mxu1 %v2802_v7 }
 0x23e   :  { %v2582_v34 = vpop.f32.mrb[4].mxu1 }
 0x23f   :  { %v413_v35 = vpop.f32.mrb[5].mxu1  ;;  %v423_v37 = vmul.f32 0.17677669, %v2582_v34 }
 0x240   :  { %v422_v36 = vmul.f32 0.17677669, %v413_v35 }
 0x241   :  { %v428_v40 = vsel %vm424_vm3, %v423_v37, -inf }
 0x242   :  { %v425_v38 = vsel %vm424_vm3, %v422_v36, -inf }
 0x243   :  { %426 = vmax.xlane.f32.xlu0 %v425_v38  ;;  %v242_v38 = vld [vmem:[#allocation8 + $0x38] sm:$0xff] }
 0x246   :  { %v2596_v39 = vpop.f32.mrb[6].mxu1 }
 0x247   :  { %429 = vmax.xlane.f32.xlu0 %v428_v40  ;;  %v612_v41 = vpop.f32.mrb[7].mxu1  ;;  %v622_v43 = vmul.f32 0.17677669, %v2596_v39 }
 0x248   :  { %v621_v42 = vmul.f32 0.17677669, %v612_v41 }
 0x249   :  { %v626_v45 = vsel %vm424_vm3, %v622_v43, -inf }
 0x24a   :  { %v623_v44 = vsel %vm424_vm3, %v621_v42, -inf }
 0x24b   :  { %624 = vmax.xlane.f32.xlu1 %v623_v44 }
 0x24f   :  { %627 = vmax.xlane.f32.xlu1 %v626_v45 }
 0x2d0   :  { %v427_v46 = vpop.xlane.xlu0 %426 }
 0x2d1   :  { %v431_v47 = vsub.f32 %v422_v36, %v427_v46 }
 0x2d3   :  { %v433_v48 = vmul.f32 1.442695, %v431_v47 }
 0x2d4   :  { %v430_v49 = vpop.xlane.xlu0 %429 }
 0x2d5   :  { %2986 = vpow2.f32 %v433_v48  ;;  %v432_v50 = vsub.f32 %v423_v37, %v430_v49  ;;  %v241_v37 = vld [vmem:[#allocation8 + $0x30] sm:$0xff] }
 0x2d7   :  { %v435_v51 = vmul.f32 1.442695, %v432_v50 }
 0x2d8   :  { %v625_v52 = vpop.xlane.xlu1 %624 }
 0x2d9   :  { %2988 = vpow2.f32 %v435_v51  ;;  %v629_v53 = vsub.f32 %v621_v42, %v625_v52 }
 0x2db   :  { %v631_v54 = vmul.f32 1.442695, %v629_v53 }
 0x2dc   :  { %v628_v55 = vpop.xlane.xlu1 %627 }
 0x2dd   :  { %2990 = vpow2.f32 %v631_v54  ;;  %v630_v56 = vsub.f32 %v622_v43, %v628_v55  ;;  %v2794_v43 = vpack.c.bf16 %v242_v38, %v241_v37 }
 0x2df   :  { %v2987_v57 = vpop.eup %2986  ;;  %v633_v58 = vmul.f32 1.442695, %v630_v56 }
 0x2e0   :  { %v437_v59 = vsel %vm424_vm3, %v2987_v57, 0.0 }
 0x2e1   :  { %2992 = vpow2.f32 %v633_v58  ;;  %438 = vadd.xlane.f32.xlu0 %v437_v59 }
 0x2e3   :  { %v2989_v60 = vpop.eup %2988 }
 0x2e4   :  { %v440_v61 = vsel %vm424_vm3, %v2989_v60, 0.0 }
 0x2e5   :  { %441 = vadd.xlane.f32.xlu1 %v440_v61 }
 0x2e7   :  { %v2991_v62 = vpop.eup %2990 }
 0x2e8   :  { %v635_v63 = vsel %vm424_vm3, %v2991_v62, 0.0 }
 0x2e9   :  { %636 = vadd.xlane.f32.xlu0 %v635_v63 }
 0x2eb   :  { %v2993_v0 = vpop.eup %2992 }
 0x2ec   :  { %v638_v1 = vsel %vm424_vm3, %v2993_v0, 0.0 }
 0x2ed   :  { %639 = vadd.xlane.f32.xlu1 %v638_v1 }
 0x2fe   :  { %2962 = vrot.lane.b32.xlu1 %v3434_v33, %s3223_s6 }
 0x2ff   :  { %2957 = vrot.lane.b32.xlu0 %v3428_v27, %s3223_s6 }
 0x302   :  { %2967 = vrot.lane.b32.xlu1 %v3428_v27, %s3224_s25 }
 0x306   :  { %2972 = vrot.lane.b32.xlu1 %v3434_v33, %s3224_s25 }
 0x36e   :  { %v439_v8 = vpop.xlane.xlu0 %438 }
 0x36f   :  { %2994 = vrcp.f32 %v439_v8 }
 0x372   :  { %v442_v9 = vpop.xlane.xlu1 %441 }
 0x373   :  { %2996 = vrcp.f32 %v442_v9 }
 0x376   :  { %v637_v10 = vpop.xlane.xlu0 %636 }
 0x377   :  { %2998 = vrcp.f32 %v637_v10 }
 0x379   :  { %v2995_v11 = vpop.eup %2994 }
 0x37a   :  { %v2958_v12 = vpop.permute.xlu0 %2957  ;;  %v640_v13 = vpop.xlane.xlu1 %639  ;;  %v445_v14 = vmul.f32 %v2995_v11, %v2987_v57 }
 0x37b   :  { %v2960_v16 = vunpack.i.h.bf16 %v2958_v12  ;;  %v2959_v18 = vunpack.i.l.bf16 %v2958_v12  ;;  %3000 = vrcp.f32 %v640_v13 }
 0x37c   :  { %2587 = vmatprep.mubr.msk.f32.mxu0 %vm424_vm3, %v445_v14 }
 0x37d   :  { %v2776_v19 = vpack.c.bf16 %v2960_v16, %v2959_v18  ;;  %v2997_v20 = vpop.eup %2996 }
 0x37e   :  { %v2963_v21 = vpop.permute.xlu1 %2962  ;;  %v446_v29 = vmul.f32 %v2997_v20, %v2989_v60 }
 0x37f   :  { %v2965_v24 = vunpack.i.h.bf16 %v2963_v21  ;;  %v2964_v26 = vunpack.i.l.bf16 %v2963_v21  ;;  %2777 = vmatprep.subr.bf16.mxu0 %v2776_v19 }
 0x380   :  { %2779 = vmatpush3.bf16.msra.mxu0 %v2776_v19 }
 0x381   :  { %v2999_v28 = vpop.eup %2998  ;;  %v2786_v30 = vpack.c.bf16 %v2965_v24, %v2964_v26 }
 0x382   :  { %v2968_v32 = vpop.permute.xlu1 %2967  ;;  %v643_v34 = vmul.f32 %v2999_v28, %v2991_v62 }
 0x383   :  { %v2970_v35 = vunpack.i.h.bf16 %v2968_v32  ;;  %v2969_v36 = vunpack.i.l.bf16 %v2968_v32  ;;  %2588 = vmatmul.mubr.msk.f32.vlgmr.msra.gmra.mrb[4].mxu0 %vm424_vm3, %v446_v29  ;;  %2787 = vmatprep.subr.bf16.mxu0 %v2786_v30 }
 0x384   :  { %2789 = vmatpush3.bf16.msra.mxu0 %v2786_v30  ;;  %2601 = vmatprep.mubr.msk.f32.mxu0 %vm424_vm3, %v643_v34 }
 0x385   :  { %v3001_v39 = vpop.eup %3000  ;;  %v2806_v40 = vpack.c.bf16 %v2970_v35, %v2969_v36  ;;  %2791 = vmatprep.subr.bf16.mxu0 %v2790_v31 }
 0x386   :  { %v644_v41 = vmul.f32 %v3001_v39, %v2993_v0  ;;  %v2973_v42 = vpop.permute.xlu1 %2972 }
 0x387   :  { %2808 = vmatprep.subr.msk.bf16.mxu1 %vm3423_vm2, %v2806_v40  ;;  %v2975_v44 = vunpack.i.h.bf16 %v2973_v42  ;;  %v2974_v45 = vunpack.i.l.bf16 %v2973_v42 }
 0x388   :  { %2602 = vmatmul.mubr.msk.f32.vlgmr.msra.gmra.mrb[6].mxu0 %vm424_vm3, %v644_v41 }
 0x389   :  { %2793 = vmatpush3.bf16.msra.mxu0 %v2790_v31  ;;  %v2816_v46 = vpack.c.bf16 %v2975_v44, %v2974_v45  ;;  %v840_v45 = vld [vmem:[#allocation8 + $0x68] sm:$0xff] }
 0x38a   :  { %2795 = vmatprep.subr.bf16.mxu0 %v2794_v43 }
 0x38d   :  { %2797 = vmatpush3.bf16.msra.mxu0 %v2794_v43 }
 0x38e   :  { %2818 = vmatprep.subr.msk.bf16.mxu0 %vm3423_vm2, %v2816_v46 }
 0x456   :  { %v2589_v47 = vpop.f32.mrb[4].mxu0 }
 0x457   :  { %v525_v48 = vpop.f32.mrb[5].mxu0 }
 0x458   :  { %2612 = vmatprep.mubr.msk.f32.mxu0 %vm243_vm1, %v525_v48 }
 0x459   :  { %2613 = vmatmul.mubr.msk.f32.vlgmr.msra.gmra.mrb[8].mxu0 %vm243_vm1, %v2589_v47 }
 0x45a   :  { %2821 = vmatpush3.bf16.xpose.msk.msra.mxu0 %vm3423_vm2, %v2816_v46 }
 0x45b   :  { %v2603_v49 = vpop.f32.mrb[6].mxu0 }
 0x45c   :  { %v723_v50 = vpop.f32.mrb[7].mxu0 }
 0x45d   :  { %2615 = vmatprep.mubr.msk.f32.mxu0 %vm243_vm1, %v723_v50 }
 0x45e   :  { %2616 = vmatmul.mubr.msk.f32.gmra.mrb[10].mxu0 %vm243_vm1, %v2603_v49 }
 0x52c   :  { %v2614_v51 = vpop.f32.mrb[8].mxu0 }
 0x52d   :  { %v810_v52 = vpop.f32.mrb[9].mxu0  ;;  %v3473_v54 = vadd.f32 %v2614_v51, %v3410_v17 }
 0x52e   :  { %v3470_v53 = vadd.f32 %v810_v52, %v3406_v15  ;;  %v841_v52 = vld [vmem:[#allocation8 + $0x70] sm:$0xff] }
 0x530   :  { %2626 = vmatprep.mubr.msk.f32.mxu1 %vm243_vm1, %v3470_v53 }
 0x531   :  { %v2617_v55 = vpop.f32.mrb[10].mxu0  ;;  %2627 = vmatmul.mubr.msk.f32.vlgmr.msra.gmra.mrb[8].mxu1 %vm243_vm1, %v3473_v54 }
 0x532   :  { %2811 = vmatpush3.bf16.xpose.msk.msra.mxu1 %vm3423_vm2, %v2806_v40  ;;  %v820_v56 = vpop.f32.mrb[11].mxu0  ;;  %v3485_v58 = vadd.f32 %v2617_v55, %v3410_v17  ;;  %v842_v55 = vld [vmem:[#allocation8 + $0x78] sm:$0xff] }
 0x533   :  { %v3482_v57 = vadd.f32 %v820_v56, %v3406_v15 }
 0x535   :  { %2629 = vmatprep.mubr.msk.f32.mxu1 %vm243_vm1, %v3482_v57 }
 0x536   :  { %2630 = vmatmul.mubr.msk.f32.gmra.mrb[10].mxu1 %vm243_vm1, %v3485_v58 }
 0x604   :  { %v2628_v59 = vpop.f32.mrb[8].mxu1 }
 0x605   :  { %v921_v60 = vpop.f32.mrb[9].mxu1 }
 0x606   :  { %2636 = vmatprep.mubr.msk.f32.mxu1 %vm243_vm1, %v921_v60  ;;  %v2830_v60 = vpack.c.bf16 %v842_v55, %v841_v52  ;;  %v1465_v52 = vld [vmem:[#allocation10 + $0x98] sm:$0xff]  ;;  %v2024_v55 = vld [vmem:[#allocation13] sm:$0xff] }
 0x607   :  { %2637 = vmatmul.mubr.msk.f32.vlgmr.msra.gmra.mrb[12].mxu1 %vm243_vm1, %v2628_v59 }
 0x609   :  { %v2631_v25 = vpop.f32.mrb[10].mxu1 }
 0x60a   :  { %v931_v61 = vpop.f32.mrb[11].mxu1 }
 0x60b   :  { %2650 = vmatprep.mubr.msk.f32.mxu0 %vm243_vm1, %v931_v61  ;;  %v1457_v61 = vld [vmem:[#allocation10 + $0x58] sm:$0xff] }
 0x60c   :  { %2651 = vmatmul.mubr.msk.f32.vlgmr.msra.gmra.mrb[12].mxu0 %vm243_vm1, %v2631_v25  ;;  %v1447_v25 = vld [vmem:[#allocation10 + $0x8] sm:$0xff] }
 0x6da   :  { %v2638_v15 = vpop.f32.mrb[12].mxu1 }
 0x6db   :  { %v1030_v17 = vmul.f32 0.17677669, %v2638_v15  ;;  %v1020_v62 = vpop.f32.mrb[13].mxu1  ;;  %v1449_v15 = vld [vmem:[#allocation10 + $0x18] sm:$0xff] }
 0x6dc   :  { %v1029_v63 = vmul.f32 0.17677669, %v1020_v62  ;;  %v1459_v62 = vld [vmem:[#allocation10 + $0x68] sm:$0xff] }
 0x6dd   :  { %v1034_v0 = vsel %vm424_vm3, %v1030_v17, -inf }
 0x6de   :  { %1035 = vmax.xlane.f32.xlu1 %v1034_v0  ;;  %v1031_v1 = vsel %vm424_vm3, %v1029_v63, -inf  ;;  %v1456_v0 = vld [vmem:[#allocation10 + $0x50] sm:$0xff] }
 0x6df   :  { %v2652_v2 = vpop.f32.mrb[12].mxu0  ;;  %1032 = vmax.xlane.f32.xlu0 %v1031_v1  ;;  %v2842_v1 = vpack.c.bf16 %v1459_v62, %v1449_v15 }
 0x6e0   :  { %v1220_v3 = vpop.f32.mrb[13].mxu0  ;;  %v1230_v5 = vmul.f32 0.17677669, %v2652_v2 }
 0x6e1   :  { %v1229_v4 = vmul.f32 0.17677669, %v1220_v3  ;;  %v1448_v3 = vld [vmem:[#allocation10 + $0x10] sm:$0xff] }
 0x6e2   :  { %v1234_v7 = vsel %vm424_vm3, %v1230_v5, -inf }
 0x6e3   :  { %v1231_v6 = vsel %vm424_vm3, %v1229_v4, -inf }
 0x6e4   :  { %1232 = vmax.xlane.f32.xlu0 %v1231_v6 }
 0x6e8   :  { %1235 = vmax.xlane.f32.xlu0 %v1234_v7 }
 0x76b   :  { %v1036_v8 = vpop.xlane.xlu1 %1035 }
 0x76c   :  { %v1038_v9 = vsub.f32 %v1030_v17, %v1036_v8  ;;  %v1033_v10 = vpop.xlane.xlu0 %1032  ;;  %v2834_v17 = vpack.c.bf16 %v1457_v61, %v1447_v25 }
 0x76d   :  { %v1037_v11 = vsub.f32 %v1029_v63, %v1033_v10  ;;  %v1446_v63 = vld [vmem:[#allocation10] sm:$0xff]  ;;  %v1467_v10 = vld [vmem:[#allocation10 + $0xa8] sm:$0xff] }
 0x76e   :  { %v1041_v12 = vmul.f32 1.442695, %v1038_v9  ;;  %v2836_v2 = vpack.c.bf16 %v1456_v0, %v1446_v63  ;;  %2835 = vmatprep.subr.bf16.mxu0 %v2834_v17  ;;  %v1454_v63 = vld [vmem:[#allocation10 + $0x40] sm:$0xff]  ;;  %v1475_v0 = vld [vmem:[#allocation10 + $0xe8] sm:$0xff] }
 0x76f   :  { %v1039_v13 = vmul.f32 1.442695, %v1037_v11  ;;  %v1477_v11 = vld [vmem:[#allocation10 + $0xf8] sm:$0xff] }
 0x770   :  { %3002 = vpow2.f32 %v1041_v12  ;;  %2837 = vmatpush1.bf16.msra.mxu0 %v2836_v2  ;;  %v1469_v12 = vld [vmem:[#allocation10 + $0xb8] sm:$0xff] }
 0x771   :  { %3004 = vpow2.f32 %v1039_v13  ;;  %v1233_v14 = vpop.xlane.xlu0 %1232  ;;  %v2838_v13 = vpack.c.bf16 %v1477_v11, %v1467_v10  ;;  %v2026_v2 = vld [vmem:[#allocation13 + $0x10] sm:$0xff] }
 0x772   :  { %v1237_v16 = vsub.f32 %v1229_v4, %v1233_v14  ;;  %v1458_v4 = vld [vmem:[#allocation10 + $0x60] sm:$0xff]  ;;  %v1479_v14 = vld [vmem:[#allocation10 + $0x108] sm:$0xff] }
 0x773   :  { %v2844_v6 = vpack.c.bf16 %v1458_v4, %v1448_v3  ;;  %2839 = vmatprep.subr.bf16.mxu0 %v2838_v13  ;;  %v2027_v3 = vld [vmem:[#allocation13 + $0x18] sm:$0xff] }
 0x774   :  { %v1239_v18 = vmul.f32 1.442695, %v1237_v16  ;;  %v1466_v16 = vld [vmem:[#allocation10 + $0xa0] sm:$0xff] }
 0x775   :  { %v1236_v19 = vpop.xlane.xlu0 %1235  ;;  %v2031_v13 = vld [vmem:[#allocation13 + $0x38] sm:$0xff] }
 0x776   :  { %3006 = vpow2.f32 %v1239_v18  ;;  %v1238_v20 = vsub.f32 %v1230_v5, %v1236_v19  ;;  %v1476_v18 = vld [vmem:[#allocation10 + $0xf0] sm:$0xff]  ;;  %v2846_v19 = vpack.c.bf16 %v1479_v14, %v1469_v12  ;;  %v2030_v12 = vld [vmem:[#allocation13 + $0x30] sm:$0xff] }
 0x777   :  { %v2886_v14 = vpack.c.bf16 %v2031_v13, %v2030_v12  ;;  %v1443_v12 = vld [vmem:[#allocation11 + $0x10] sm:$0x77] }
 0x778   :  { %v1241_v21 = vmul.f32 1.442695, %v1238_v20  ;;  %v2840_v20 = vpack.c.bf16 %v1476_v18, %v1466_v16  ;;  %v2032_v16 = vld [vmem:[#allocation13 + $0x40] sm:$0xff]  ;;  %v2033_v18 = vld [vmem:[#allocation13 + $0x48] sm:$0xff] }
 0x77a   :  { %v3003_v22 = vpop.eup %3002  ;;  %3008 = vpow2.f32 %v1241_v21  ;;  %v1468_v21 = vld [vmem:[#allocation10 + $0xb0] sm:$0xff]  ;;  %2841 = vmatpush1.bf16.msra.mxu0 %v2840_v20  ;;  %v2034_v20 = vld [vmem:[#allocation13 + $0x50] sm:$0xff] }
 0x77b   :  { %v3005_v23 = vpop.eup %3004  ;;  %v1046_v24 = vsel %vm424_vm3, %v3003_v22, 0.0 }
 0x77c   :  { %1047 = vadd.xlane.f32.xlu1 %v1046_v24  ;;  %v1043_v26 = vsel %vm424_vm3, %v3005_v23, 0.0  ;;  %v3226_v24 = vmov 0.0  }
 0x77d   :  { %1044 = vadd.xlane.f32.xlu0 %v1043_v26  ;;  %1657 = vmatprep.mubr.f32.mxu0 %v3226_v24  ;;  %v1451_v26 = vld [vmem:[#allocation10 + $0x28] sm:$0xff] }
 0x780   :  { %v3007_v28 = vpop.eup %3006 }
 0x781   :  { %v1243_v29 = vsel %vm424_vm3, %v3007_v28, 0.0 }
 0x782   :  { %1244 = vadd.xlane.f32.xlu0 %v1243_v29  ;;  %v1453_v29 = vld [vmem:[#allocation10 + $0x38] sm:$0xff] }
 0x784   :  { %v3009_v30 = vpop.eup %3008 }
 0x785   :  { %v1246_v31 = vsel %vm424_vm3, %v3009_v30, 0.0 }
 0x786   :  { %1247 = vadd.xlane.f32.xlu1 %v1246_v31  ;;  %v1463_v31 = vld [vmem:[#allocation10 + $0x88] sm:$0xff] }
 0x797   :  { %2982 = vrot.lane.b32.xlu1 %v3434_v33, %s3225_s26  ;;  %v839_v33 = vld [vmem:[#allocation8 + $0x60] sm:$0xff] }
 0x798   :  { %2977 = vrot.lane.b32.xlu0 %v3428_v27, %s3225_s26  ;;  %v2826_v50 = vpack.c.bf16 %v840_v45, %v839_v33 }
 0x809   :  { %v1048_v32 = vpop.xlane.xlu1 %1047 }
 0x80a   :  { %v1045_v34 = vpop.xlane.xlu0 %1044 }
 0x80b   :  { %3010 = vrcp.f32 %v1045_v34  ;;  %v1450_v34 = vld [vmem:[#allocation10 + $0x20] sm:$0xff] }
 0x80c   :  { %3012 = vrcp.f32 %v1048_v32  ;;  %v2858_v32 = vpack.c.bf16 %v1463_v31, %v1453_v29  ;;  %v2038_v29 = vld [vmem:[#allocation13 + $0x70] sm:$0xff] }
 0x80f   :  { %v1245_v35 = vpop.xlane.xlu0 %1244 }
 0x810   :  { %3014 = vrcp.f32 %v1245_v35  ;;  %v1460_v35 = vld [vmem:[#allocation10 + $0x70] sm:$0xff] }
 0x811   :  { %v2852_v33 = vpack.c.bf16 %v1460_v35, %v1450_v34  ;;  %v2135_v34 = vld [vmem:[#allocation13 + $0x88] sm:$0xff]  ;;  %v2136_v35 = vld [vmem:[#allocation13 + $0x90] sm:$0xff] }
 0x813   :  { %v1248_v36 = vpop.xlane.xlu1 %1247  ;;  %v2978_v37 = vpop.permute.xlu0 %2977 }
 0x814   :  { %3016 = vrcp.f32 %v1248_v36  ;;  %v2980_v38 = vunpack.i.h.bf16 %v2978_v37  ;;  %v2979_v39 = vunpack.i.l.bf16 %v2978_v37  ;;  %v1452_v36 = vld [vmem:[#allocation10 + $0x30] sm:$0xff]  ;;  %v1462_v37 = vld [vmem:[#allocation10 + $0x80] sm:$0xff] }
 0x815   :  { %v3011_v40 = vpop.eup %3010  ;;  %v2860_v45 = vpack.c.bf16 %v1462_v37, %v1452_v36  ;;  %v2137_v37 = vld [vmem:[#allocation13 + $0x98] sm:$0xff] }
 0x816   :  { %v2812_v41 = vpack.c.bf16 %v2980_v38, %v2979_v39  ;;  %v1051_v42 = vmul.f32 %v3011_v40, %v3005_v23  ;;  %v3013_v43 = vpop.eup %3012  ;;  %v1471_v38 = vld [vmem:[#allocation10 + $0xc8] sm:$0xff]  ;;  %v1481_v40 = vld [vmem:[#allocation10 + $0x118] sm:$0xff] }
 0x817   :  { %v2983_v44 = vpop.permute.xlu1 %2982  ;;  %v1052_v48 = vmul.f32 %v3013_v43, %v3003_v22  ;;  %v1478_v22 = vld [vmem:[#allocation10 + $0x100] sm:$0xff] }
 0x818   :  { %v2985_v46 = vunpack.i.h.bf16 %v2983_v44  ;;  %v2984_v27 = vunpack.i.l.bf16 %v2983_v44  ;;  %2813 = vmatprep.subr.bf16.mxu1 %v2812_v41  ;;  %2643 = vmatprep.mubr.msk.f32.mxu1 %vm424_vm3, %v1051_v42  ;;  %v2848_v23 = vpack.c.bf16 %v1478_v22, %v1468_v21  ;;  %v1483_v42 = vld [vmem:[#allocation10 + $0x128] sm:$0xff]  ;;  %v2035_v21 = vld [vmem:[#allocation13 + $0x58] sm:$0xff] }
 0x819   :  { %2815 = vmatpush3.bf16.msra.mxu1 %v2812_v41  ;;  %v1473_v41 = vld [vmem:[#allocation10 + $0xd8] sm:$0xff]  ;;  %v2894_v22 = vpack.c.bf16 %v2035_v21, %v2034_v20 }
 0x81a   :  { %v3015_v47 = vpop.eup %3014  ;;  %v2822_v49 = vpack.c.bf16 %v2985_v46, %v2984_v27  ;;  %v1470_v46 = vld [vmem:[#allocation10 + $0xc0] sm:$0xff]  ;;  %v1480_v27 = vld [vmem:[#allocation10 + $0x110] sm:$0xff] }
 0x81b   :  { %v1251_v51 = vmul.f32 %v3015_v47, %v3007_v28  ;;  %v1461_v28 = vld [vmem:[#allocation10 + $0x78] sm:$0xff]  ;;  %v2854_v47 = vpack.c.bf16 %v1481_v40, %v1471_v38  ;;  %v2856_v25 = vpack.c.bf16 %v1480_v27, %v1470_v46  ;;  %v2910_v38 = vpack.c.bf16 %v2137_v37, %v2136_v35  ;;  %v2145_v27 = vld [vmem:[#allocation13 + $0xd8] sm:$0xff] }
 0x81c   :  { %2644 = vmatmul.mubr.msk.f32.vlgmr.msra.gmra.mrb[14].mxu1 %vm424_vm3, %v1052_v48  ;;  %2823 = vmatprep.subr.bf16.mxu1 %v2822_v49  ;;  %v2862_v48 = vpack.c.bf16 %v1483_v42, %v1473_v41  ;;  %v2140_v41 = vld [vmem:[#allocation13 + $0xb0] sm:$0xff]  ;;  %v2141_v42 = vld [vmem:[#allocation13 + $0xb8] sm:$0xff] }
 0x81d   :  { %2825 = vmatpush3.bf16.msra.mxu1 %v2822_v49  ;;  %2657 = vmatprep.mubr.msk.f32.mxu1 %vm424_vm3, %v1251_v51  ;;  %v1472_v49 = vld [vmem:[#allocation10 + $0xd0] sm:$0xff]  ;;  %v1455_v51 = vld [vmem:[#allocation10 + $0x48] sm:$0xff]  ;;  %v2144_v46 = vld [vmem:[#allocation13 + $0xd0] sm:$0xff] }
 0x81e   :  { %v3017_v56 = vpop.eup %3016  ;;  %2827 = vmatprep.subr.bf16.mxu1 %v2826_v50  ;;  %v2866_v15 = vpack.c.bf16 %v1465_v52, %v1455_v51  ;;  %v1491_v51 = vlaneseq }
 0x81f   :  { %v1252_v59 = vmul.f32 %v3017_v56, %v3009_v30  ;;  %v2850_v30 = vpack.c.bf16 %v1461_v28, %v1451_v26  ;;  %v2025_v56 = vld [vmem:[#allocation13 + $0x8] sm:$0xff] }
 0x820   :  { %v2874_v17 = vpack.c.bf16 %v2025_v56, %v2024_v55  ;;  %v2037_v26 = vld [vmem:[#allocation13 + $0x68] sm:$0xff]  ;;  %v3588_v52 = vshrl.u32 %v1491_v51, 7  ;;  %v3593_v56 = vld [vmem:[#allocation11] sm:$0x77]  ;;  %vm2286_vm4 = vcmp.lt.s32.totalorder %v1491_v51, 512 }
 0x821   :  { %2658 = vmatmul.mubr.msk.f32.vlgmr.msra.gmra.mrb[16].mxu1 %vm424_vm3, %v1252_v59  ;;  %2851 = vmatprep.subr.bf16.mxu0 %v2850_v30  ;;  %v2039_v30 = vld [vmem:[#allocation13 + $0x78] sm:$0xff] }
 0x822   :  { %2829 = vmatpush3.bf16.msra.mxu1 %v2826_v50  ;;  %v1482_v50 = vld [vmem:[#allocation10 + $0x120] sm:$0xff]  ;;  %v2902_v31 = vpack.c.bf16 %v2039_v30, %v2038_v29  ;;  %v3591_v55 = vsub.s32 0, %v3588_v52  ;;  %v1444_v29 = vld [vmem:[#allocation11 + $0x18] sm:$0x77] }
 0x823   :  { %2831 = vmatprep.subr.bf16.mxu1 %v2830_v60  ;;  %v2864_v61 = vpack.c.bf16 %v1482_v50, %v1472_v49  ;;  %v2147_v49 = vld [vmem:[#allocation13 + $0xe8] sm:$0xff] }
 0x824   :  { %v1518_v37 = vrot.slane %v1444_v29, %v3591_v55 }
 0x826   :  { %2833 = vmatpush3.bf16.msra.mxu1 %v2830_v60 }
 0x827   :  { %2843 = vmatprep.subr.bf16.mxu1 %v2842_v1  ;;  %v1485_v1 = vld [vmem:[#allocation10 + $0x138] sm:$0xff] }
 0x8ef   :  { %v2645_v5 = vpop.f32.mrb[14].mxu1 }
 0x8f0   :  { %v1131_v7 = vpop.f32.mrb[15].mxu1 }
 0x8f1   :  { %2668 = vmatprep.mubr.msk.f32.mxu1 %vm243_vm1, %v1131_v7  ;;  %v2878_v7 = vpack.c.bf16 %v2027_v3, %v2026_v2 }
 0x8f2   :  { %2669 = vmatmul.mubr.msk.f32.vlgmr.msra.gmra.mrb[18].mxu1 %vm243_vm1, %v2645_v5  ;;  %v2870_v5 = vpack.c.bf16 %v1485_v1, %v1475_v0 }
 0x8f3   :  { %2845 = vmatpush1.bf16.msra.mxu1 %v2844_v6  ;;  %v1484_v6 = vld [vmem:[#allocation10 + $0x130] sm:$0xff] }
 0x8f4   :  { %v2659_v8 = vpop.f32.mrb[16].mxu1  ;;  %2847 = vmatprep.subr.bf16.mxu1 %v2846_v19  ;;  %v2890_v19 = vpack.c.bf16 %v2033_v18, %v2032_v16 }
 0x8f5   :  { %v1331_v9 = vpop.f32.mrb[17].mxu1 }
 0x8f6   :  { %2671 = vmatprep.mubr.msk.f32.mxu1 %vm243_vm1, %v1331_v9  ;;  %v2029_v9 = vld [vmem:[#allocation13 + $0x28] sm:$0xff] }
 0x8f7   :  { %2672 = vmatmul.mubr.msk.f32.gmra.mrb[20].mxu1 %vm243_vm1, %v2659_v8  ;;  %v2028_v8 = vld [vmem:[#allocation13 + $0x20] sm:$0xff] }
 0x8f8   :  { %2849 = vmatpush1.bf16.msra.mxu1 %v2848_v23  ;;  %1744 = vmatprep.mubr.f32.mxu1 %v3226_v24  ;;  %v2882_v11 = vpack.c.bf16 %v2029_v9, %v2028_v8  ;;  %v2036_v23 = vld [vmem:[#allocation13 + $0x60] sm:$0xff] }
 0x8f9   :  { %2859 = vmatprep.subr.bf16.mxu1 %v2858_v32  ;;  %v2898_v28 = vpack.c.bf16 %v2037_v26, %v2036_v23  ;;  %v2134_v32 = vld [vmem:[#allocation13 + $0x80] sm:$0xff] }
 0x8fa   :  { %v2906_v36 = vpack.c.bf16 %v2135_v34, %v2134_v32 }
 0x9c5   :  { %v2670_v39 = vpop.f32.mrb[18].mxu1 }
 0x9c6   :  { %v1418_v43 = vpop.f32.mrb[19].mxu1  ;;  %v3527_v59 = vadd.f32 %v2670_v39, %v3473_v54  ;;  %v2139_v39 = vld [vmem:[#allocation13 + $0xa8] sm:$0xff] }
 0x9c7   :  { %v3518_v44 = vadd.f32 %v1418_v43, %v3470_v53  ;;  %v2918_v43 = vpack.c.bf16 %v2141_v42, %v2140_v41 }
 0x9c9   :  { %2405 = vmatmul.mubr.msk.f32.vlgmr.msra.gmra.mrb[14].mxu0 %vm243_vm1, %v3518_v44  ;;  %2409 = vmatmul.mubr.msk.f32.vlgmr.msra.gmra.mrb[22].mxu1 %vm243_vm1, %v3518_v44 }
 0x9ca   :  { %v2673_v53 = vpop.f32.mrb[20].mxu1  ;;  %1663 = vmatprep.mubr.f32.mxu0 %v3226_v24  ;;  %1750 = vmatprep.mubr.f32.mxu1 %v3226_v24 }
 0x9cb   :  { %v1428_v60 = vpop.f32.mrb[21].mxu1  ;;  %2853 = vmatpush1.bf16.msra.mxu0 %v2852_v33  ;;  %2861 = vmatpush1.bf16.msra.mxu1 %v2860_v45  ;;  %v3545_v62 = vadd.f32 %v2673_v53, %v3485_v58  ;;  %v1474_v58 = vld [vmem:[#allocation10 + $0xe0] sm:$0xff]  ;;  %v2143_v33 = vld [vmem:[#allocation13 + $0xc8] sm:$0xff]  ;;  %v1442_v53 = vld [vmem:[#allocation11 + $0x8] sm:$0x77] }
 0x9cc   :  { %2855 = vmatprep.subr.bf16.mxu0 %v2854_v47  ;;  %2863 = vmatprep.subr.bf16.mxu1 %v2862_v48  ;;  %v3536_v54 = vadd.f32 %v1428_v60, %v3482_v57  ;;  %v1464_v57 = vld [vmem:[#allocation10 + $0x90] sm:$0xff]  ;;  %v2872_v10 = vpack.c.bf16 %v1484_v6, %v1474_v58  ;;  %v2926_v47 = vpack.c.bf16 %v2145_v27, %v2144_v46  ;;  %v2146_v48 = vld [vmem:[#allocation13 + $0xe0] sm:$0xff] }
 0x9cd   :  { %2406 = vmatmul.mubr.msk.f32.gmra.mrb[16].mxu0 %vm243_vm1, %v3527_v59  ;;  %2410 = vmatmul.mubr.msk.f32.gmra.mrb[24].mxu1 %vm243_vm1, %v3527_v59  ;;  %v2868_v4 = vpack.c.bf16 %v1464_v57, %v1454_v63  ;;  %v2930_v50 = vpack.c.bf16 %v2147_v49, %v2146_v48  ;;  %v1494_v60 = vrot.slane %v3593_v56, %v3591_v55 }
 0x9ce   :  { %1668 = vmatprep.mubr.f32.mxu0 %v3226_v24  ;;  %1754 = vmatprep.mubr.f32.mxu1 %v3226_v24 }
 0x9cf   :  { %2857 = vmatpush1.bf16.msra.mxu0 %v2856_v25  ;;  %2865 = vmatpush1.bf16.msra.mxu1 %v2864_v61  ;;  %v1502_v25 = vrot.slane %v1442_v53, %v3591_v55 }
 0x9d0   :  { %2867 = vmatprep.subr.bf16.mxu0 %v2866_v15  ;;  %2875 = vmatprep.subr.bf16.mxu1 %v2874_v17 }
 0x9d1   :  { %2407 = vmatmul.mubr.msk.f32.gmra.mrb[18].mxu0 %vm243_vm1, %v3536_v54  ;;  %2411 = vmatmul.mubr.msk.f32.gmra.mrb[26].mxu1 %vm243_vm1, %v3536_v54 }
 0x9d2   :  { %1674 = vmatprep.mubr.f32.mxu0 %v3226_v24  ;;  %1760 = vmatprep.mubr.f32.mxu1 %v3226_v24 }
 0x9d5   :  { %2408 = vmatmul.mubr.msk.f32.gmra.mrb[20].mxu0 %vm243_vm1, %v3545_v62  ;;  %2412 = vmatmul.mubr.msk.f32.gmra.mrb[28].mxu1 %vm243_vm1, %v3545_v62 }
 0x9d6   :  { %1829 = vmatprep.mubr.f32.mxu0 %v3226_v24  ;;  %1914 = vmatprep.mubr.f32.mxu1 %v3226_v24 }
 0x9d9   :  { %2413 = vmatmul.mubr.msk.f32.vlgmr.msra.gmra.mrb[22].mxu0 %vm243_vm1, %v3518_v44  ;;  %2417 = vmatmul.mubr.msk.f32.vlgmr.msra.gmra.mrb[30].mxu1 %vm243_vm1, %v3518_v44 }
 0x9da   :  { %1835 = vmatprep.mubr.f32.mxu0 %v3226_v24  ;;  %1918 = vmatprep.mubr.f32.mxu1 %v3226_v24 }
 0x9db   :  { %2869 = vmatpush1.bf16.msra.mxu0 %v2868_v4  ;;  %2877 = vmatpush3.bf16.msra.mxu1 %v2874_v17  ;;  %v1544_v17 = vrot.slane %v1494_v60, %v3591_v55 }
 0x9dc   :  { %2871 = vmatprep.subr.bf16.mxu0 %v2870_v5  ;;  %2879 = vmatprep.subr.bf16.mxu1 %v2878_v7 }
 0x9dd   :  { %2414 = vmatmul.mubr.msk.f32.gmra.mrb[24].mxu0 %vm243_vm1, %v3527_v59  ;;  %2418 = vmatmul.mubr.msk.f32.gmra.mrb[32].mxu1 %vm243_vm1, %v3527_v59 }
 0x9de   :  { %1839 = vmatprep.mubr.f32.mxu0 %v3226_v24  ;;  %1924 = vmatprep.mubr.f32.mxu1 %v3226_v24 }
 0x9df   :  { %2873 = vmatpush1.bf16.msra.mxu0 %v2872_v10  ;;  %2881 = vmatpush3.bf16.msra.mxu1 %v2878_v7 }
 0x9e0   :  { %2883 = vmatprep.subr.bf16.mxu1 %v2882_v11  ;;  %2907 = vmatprep.subr.bf16.mxu0 %v2906_v36 }
 0x9e1   :  { %2415 = vmatmul.mubr.msk.f32.gmra.mrb[26].mxu0 %vm243_vm1, %v3536_v54  ;;  %2419 = vmatmul.mubr.msk.f32.gmra.mrb[34].mxu1 %vm243_vm1, %v3536_v54 }
 0x9e2   :  { %1845 = vmatprep.mubr.f32.mxu0 %v3226_v24  ;;  %1928 = vmatprep.mubr.f32.mxu1 %v3226_v24 }
 0x9e3   :  { %2885 = vmatpush3.bf16.msra.mxu1 %v2882_v11 }
 0x9e4   :  { %2887 = vmatprep.subr.bf16.mxu1 %v2886_v14 }
 0x9e5   :  { %2416 = vmatmul.mubr.msk.f32.gmra.mrb[28].mxu0 %vm243_vm1, %v3545_v62  ;;  %2420 = vmatmul.mubr.msk.f32.gmra.mrb[36].mxu1 %vm243_vm1, %v3545_v62 }
 0x9e6   :  { %1999 = vmatprep.mubr.f32.mxu0 %v3226_v24 }
 0x9e7   :  { %2889 = vmatpush3.bf16.msra.mxu1 %v2886_v14 }
 0x9e8   :  { %2891 = vmatprep.subr.bf16.mxu1 %v2890_v19 }
 0x9e9   :  { %2421 = vmatmul.mubr.msk.f32.vlgmr.msra.gmra.mrb[30].mxu0 %vm243_vm1, %v3518_v44  ;;  %v2142_v44 = vld [vmem:[#allocation13 + $0xc0] sm:$0xff] }
 0x9ea   :  { %2003 = vmatprep.mubr.f32.mxu0 %v3226_v24  ;;  %2909 = vmatpush3.bf16.msra.mxu0 %v2906_v36  ;;  %v2922_v45 = vpack.c.bf16 %v2143_v33, %v2142_v44 }
 0x9eb   :  { %2893 = vmatpush3.bf16.msra.mxu1 %v2890_v19  ;;  %2911 = vmatprep.subr.bf16.mxu0 %v2910_v38 }
 0x9ec   :  { %2895 = vmatprep.subr.bf16.mxu1 %v2894_v22 }
 0x9ed   :  { %2422 = vmatmul.mubr.msk.f32.gmra.mrb[32].mxu0 %vm243_vm1, %v3527_v59  ;;  %v3596_v59 = vsub.s32 4, %v3588_v52 }
 0x9ee   :  { %2009 = vmatprep.mubr.f32.mxu0 %v3226_v24  ;;  %2913 = vmatpush3.bf16.msra.mxu0 %v2910_v38 }
 0x9ef   :  { %2897 = vmatpush3.bf16.msra.mxu1 %v2894_v22  ;;  %v1498_v61 = vrot.slane %v3593_v56, %v3596_v59  ;;  %v1506_v15 = vrot.slane %v1442_v53, %v3596_v59  ;;  %v1510_v22 = vrot.slane %v1443_v12, %v3591_v55 }
 0x9f0   :  { %2899 = vmatprep.subr.bf16.mxu1 %v2898_v28 }
 0x9f1   :  { %2423 = vmatmul.mubr.msk.f32.gmra.mrb[34].mxu0 %vm243_vm1, %v3536_v54  ;;  %v1552_v54 = vrot.slane %v1502_v25, %v3591_v55  ;;  %v1556_v63 = vrot.slane %v1506_v15, %v3591_v55  ;;  %v1560_v36 = vrot.slane %v1510_v22, %v3591_v55 }
 0x9f2   :  { %2013 = vmatprep.mubr.f32.mxu0 %v3226_v24  ;;  %v2138_v24 = vld [vmem:[#allocation13 + $0xa0] sm:$0xff] }
 0x9f3   :  { %2901 = vmatpush3.bf16.msra.mxu1 %v2898_v28  ;;  %v2914_v40 = vpack.c.bf16 %v2139_v39, %v2138_v24  ;;  %v1514_v28 = vrot.slane %v1443_v12, %v3596_v59  ;;  %v1522_v39 = vrot.slane %v1444_v29, %v3596_v59 }
 0x9f4   :  { %2903 = vmatprep.subr.bf16.mxu1 %v2902_v31 }
 0x9f5   :  { %2424 = vmatmul.mubr.msk.f32.gmra.mrb[36].mxu0 %vm243_vm1, %v3545_v62  ;;  %2915 = vmatprep.subr.bf16.mxu0 %v2914_v40  ;;  %v1548_v62 = vrot.slane %v1498_v61, %v3591_v55  ;;  %v1564_v24 = vrot.slane %v1514_v28, %v3591_v55  ;;  %v1572_v27 = vrot.slane %v1522_v39, %v3591_v55  ;;  %v2148_v39 = vld [vmem:[#allocation13 + $0xf0] sm:$0xff] }
 0x9f6   :  { %2917 = vmatpush3.bf16.msra.mxu0 %v2914_v40 }
 0x9f7   :  { %2905 = vmatpush3.bf16.msra.mxu1 %v2902_v31  ;;  %2919 = vmatprep.subr.bf16.mxu0 %v2918_v43 }
 0x9fa   :  { %2921 = vmatpush3.bf16.msra.mxu0 %v2918_v43 }
 0x9fb   :  { %2923 = vmatprep.subr.bf16.mxu0 %v2922_v45 }
 0x9fe   :  { %2925 = vmatpush3.bf16.msra.mxu0 %v2922_v45  ;;  %v1568_v45 = vrot.slane %v1518_v37, %v3591_v55 }
 0x9ff   :  { %2927 = vmatprep.subr.bf16.mxu0 %v2926_v47 }
 0xa02   :  { %2929 = vmatpush3.bf16.msra.mxu0 %v2926_v47 }
 0xa03   :  { %2931 = vmatprep.subr.bf16.mxu0 %v2930_v50 }
 0xa06   :  { %2933 = vmatpush3.bf16.msra.mxu0 %v2930_v50 }
 0xa9c   :  { %v1659_v57 = vpop.f32.mrb[14].mxu0  ;;  %v1746_v0 = vpop.f32.mrb[22].mxu1 }
 0xa9d   :  { %v1660_v1 = vadd.f32 %v1659_v57, %v1544_v17  ;;  %v1747_v2 = vadd.f32 %v1746_v0, %v1552_v54  ;;  %v1661_v3 = vpop.f32.mrb[15].mxu0  ;;  %v1748_v4 = vpop.f32.mrb[23].mxu1  ;;  %v1445_v57 = vld [vmem:[#allocation11 + $0x20] sm:$0x77] }
 0xa9e   :  { %v1662_v5 = vadd.f32 %v1661_v3, %v1548_v62  ;;  %v1749_v58 = vadd.f32 %v1748_v4, %v1556_v63 }
 0xa9f   :  { %2249 = vst [vmem:[%s3664_s7] sm:$0xff] %v1660_v1  ;;  %2251 = vst [vmem:[#allocation14] sm:$0xff] %v1747_v2 }
 0xaa0   :  { %v2020_v6 = vmax.f32 %v1662_v5, 0.0  ;;  %2252 = vst [vmem:[#allocation14 + $0x8] sm:$0xff] %v1749_v58  ;;  %v1665_v7 = vpop.f32.mrb[16].mxu0  ;;  %v1752_v8 = vpop.f32.mrb[24].mxu1  ;;  %v1526_v5 = vrot.slane %v1445_v57, %v3591_v55  ;;  %v3227_v58 = vmov 1966171168  }
 0xaa1   :  { %v1666_v9 = vpop.f32.mrb[17].mxu0  ;;  %v1753_v10 = vpop.f32.mrb[25].mxu1  ;;  %v1530_v8 = vrot.slane %v1445_v57, %v3596_v59 }
 0xaa2   :  { %v1667_v11 = vadd.f32 %v1666_v9, %v1548_v62  ;;  %2706 = vmatprep.mubr.f32.mxu1 %v2020_v6  ;;  %v2262_v6 = vunpack.c.l.s4 %v3227_v58  ;;  %v1576_v12 = vrot.slane %v1526_v5, %v3591_v55 }
 0xaa4   :  { %v2021_v13 = vmax.f32 %v1667_v11, 0.0  ;;  %v1670_v14 = vpop.f32.mrb[18].mxu0  ;;  %v1756_v16 = vpop.f32.mrb[26].mxu1 }
 0xaa5   :  { %v1671_v18 = vadd.f32 %v1670_v14, %v1544_v17  ;;  %v1757_v19 = vadd.f32 %v1756_v16, %v1552_v54  ;;  %v1672_v20 = vpop.f32.mrb[19].mxu0  ;;  %v1758_v21 = vpop.f32.mrb[27].mxu1  ;;  %v1580_v14 = vrot.slane %v1530_v8, %v3591_v55 }
 0xaa6   :  { %v1673_v23 = vadd.f32 %v1672_v20, %v1548_v62  ;;  %v1759_v26 = vadd.f32 %v1758_v21, %v1556_v63  ;;  %2707 = vmatmul.mubr.f32.vlgmr.msra.gmra.mrb[38].mxu1 %v2021_v13  ;;  %v2263_v13 = vunpack.c.0.s8 %v2262_v6 }
 0xaa7   :  { %2427 = vst [vmem:[%s3664_s7 + $0x8] sm:$0xff] %v1671_v18  ;;  %2294 = vst [vmem:[#allocation14 + $0x20] sm:$0xff] %v1757_v19 }
 0xaa8   :  { %v2022_v30 = vmax.f32 %v1673_v23, 0.0  ;;  %2295 = vst [vmem:[#allocation14 + $0x28] sm:$0xff] %v1759_v26  ;;  %v1676_v31 = vpop.f32.mrb[20].mxu0  ;;  %v1762_v32 = vpop.f32.mrb[28].mxu1  ;;  %v2266_v20 = vsub.s32 %v2263_v13, %v3588_v52 }
 0xaa9   :  { %v1677_v34 = vpop.f32.mrb[21].mxu0  ;;  %v1763_v35 = vpop.f32.mrb[29].mxu1 }
 0xaaa   :  { %v1678_v38 = vadd.f32 %v1677_v34, %v1548_v62  ;;  %2709 = vmatprep.mubr.f32.mxu1 %v2022_v30 }
 0xaac   :  { %v2023_v40 = vmax.f32 %v1678_v38, 0.0  ;;  %v1831_v41 = vpop.f32.mrb[22].mxu0  ;;  %v1916_v42 = vpop.f32.mrb[30].mxu1 }
 0xaad   :  { %v1832_v43 = vadd.f32 %v1831_v41, %v1560_v36  ;;  %v1833_v44 = vpop.f32.mrb[23].mxu0  ;;  %v1917_v33 = vpop.f32.mrb[31].mxu1  ;;  %v2042_v41 = vsub.s32 1, %v3588_v52 }
 0xaae   :  { %v1834_v46 = vadd.f32 %v1833_v44, %v1564_v24  ;;  %2710 = vmatmul.mubr.f32.gmra.mrb[40].mxu1 %v2023_v40  ;;  %v2149_v40 = vld [vmem:[#allocation13 + $0xf8] sm:$0xff] }
 0xaaf   :  { %2253 = vst [vmem:[#allocation14 + $0x10] sm:$0xff] %v1832_v43  ;;  %v2934_v51 = vpack.c.bf16 %v2149_v40, %v2148_v39  ;;  %v2043_v42 = vrot.slane %v3593_v56, %v2042_v41 }
 0xab0   :  { %2254 = vst [vmem:[#allocation14 + $0x18] sm:$0xff] %v1834_v46  ;;  %v1837_v47 = vpop.f32.mrb[24].mxu0  ;;  %v1920_v48 = vpop.f32.mrb[32].mxu1 }
 0xab1   :  { %v1921_v49 = vadd.f32 %v1920_v48, %v1568_v45  ;;  %v1838_v50 = vpop.f32.mrb[25].mxu0  ;;  %v1922_v53 = vpop.f32.mrb[33].mxu1  ;;  %2935 = vmatprep.subr.bf16.mxu0 %v2934_v51 }
 0xab2   :  { %v1923_v60 = vadd.f32 %v1922_v53, %v1572_v27  ;;  %2937 = vmatpush3.bf16.msra.mxu0 %v2934_v51 }
 0xab4   :  { %v2259_v25 = vcombine.low %v1921_v49, %v1923_v60  ;;  %v1841_v61 = vpop.f32.mrb[26].mxu0  ;;  %v1926_v15 = vpop.f32.mrb[34].mxu1 }
 0xab5   :  { %v1842_v17 = vadd.f32 %v1841_v61, %v1560_v36  ;;  %v1843_v54 = vpop.f32.mrb[27].mxu0  ;;  %v1927_v62 = vpop.f32.mrb[35].mxu1 }
 0xab6   :  { %v1844_v63 = vadd.f32 %v1843_v54, %v1564_v24  ;;  %v2267_v28 = vrot.slane %v2259_v25, %v2266_v20 }
 0xab7   :  { %2296 = vst [vmem:[#allocation14 + $0x30] sm:$0xff] %v1842_v17 }
 0xab8   :  { %2297 = vst [vmem:[#allocation14 + $0x38] sm:$0xff] %v1844_v63  ;;  %v1847_v0 = vpop.f32.mrb[28].mxu0  ;;  %v1930_v1 = vpop.f32.mrb[36].mxu1 }
 0xab9   :  { %v1931_v2 = vadd.f32 %v1930_v1, %v1568_v45  ;;  %v1848_v3 = vpop.f32.mrb[29].mxu0  ;;  %v1932_v4 = vpop.f32.mrb[37].mxu1 }
 0xaba   :  { %v1933_v7 = vadd.f32 %v1932_v4, %v1572_v27 }
 0xabc   :  { %v2302_v9 = vcombine.low %v1931_v2, %v1933_v7  ;;  %v2001_v10 = vpop.f32.mrb[30].mxu0 }
 0xabd   :  { %v2002_v11 = vpop.f32.mrb[31].mxu0 }
 0xabe   :  { %v2310_v36 = vrot.slane %v2302_v9, %v2266_v20 }
 0xac0   :  { %v2005_v16 = vpop.f32.mrb[32].mxu0 }
 0xac1   :  { %v2006_v18 = vadd.f32 %v2005_v16, %v1576_v12  ;;  %v2007_v19 = vpop.f32.mrb[33].mxu0 }
 0xac2   :  { %v2008_v21 = vadd.f32 %v2007_v19, %v1580_v14 }
 0xac4   :  { %v2260_v22 = vcombine.low %v2006_v18, %v2008_v21  ;;  %v2011_v23 = vpop.f32.mrb[34].mxu0 }
 0xac5   :  { %v2012_v26 = vpop.f32.mrb[35].mxu0 }
 0xac6   :  { %v2274_v29 = vrot.slane %v2260_v22, %v2266_v20 }
 0xac8   :  { %v2275_v59 = vcombine.low %v2267_v28, %v2274_v29  ;;  %v2015_v30 = vpop.f32.mrb[36].mxu0 }
 0xac9   :  { %v2016_v31 = vadd.f32 %v2015_v30, %v1576_v12  ;;  %v2017_v32 = vpop.f32.mrb[37].mxu0 }
 0xaca   :  { %v2282_v34 = vrot.slane %v2275_v59, %v2266_v20  ;;  %v2018_v35 = vadd.f32 %v2017_v32, %v1580_v14 }
 0xacc   :  { %2288 = vst.msk [vmem:[%s3666_s9] sm:$0xf] %vm2286_vm4, %v2282_v34  ;;  %v2303_v55 = vcombine.low %v2016_v31, %v2018_v35 }
 0xace   :  { %v2317_v37 = vrot.slane %v2303_v55, %v2266_v20 }
 0xad0   :  { %v2318_v38 = vcombine.low %v2310_v36, %v2317_v37 }
 0xad2   :  { %v2325_v24 = vrot.slane %v2318_v38, %v2266_v20 }
 0xad4   :  { %2429 = vst.msk [vmem:[%s3666_s9 + $0x4] sm:$0xf] %vm2286_vm4, %v2325_v24  ;;  %s3228_s9 = smov [#allocation14]  }
 0xad5   :  { %s2340_s20 = sshll.u32 %s3228_s9, 4  ;;  %s2341_s20 = int_to_ptr.vmem [resolvable:$true] %s2340_s20 }
 0xad6   :  { %s3180_s2 = scalar_lea.vmem %s2341_s20, 1024  ;;  %p3185_p1 = scmp.lt.s32.totalorder %s2341_s20, %s2341_s20 }
 0xad7   :  { %p3181_p0 = scmp.ne.s32.totalorder %s2341_s20, %s3180_s2  ;;  %p3186_p2 = scmp.lt.s32.totalorder %s3180_s2, %s3180_s2 }
 0xad9   :  { %p3187_p3 = por %p3186_p2, %p3185_p1 }
 0xadb   :  { %p3188_p4 = pnand %p3187_p3, %p3181_p0 }
 0xb79   :  { %v2708_v43 = vpop.f32.mrb[38].mxu1 }
 0xb7a   :  { %v2116_v44 = vadd.f32 %v2708_v43, %v2043_v42  ;;  %v2110_v33 = vpop.f32.mrb[39].mxu1 }
 0xb7b   :  { %v2111_v45 = vadd.f32 %v2110_v33, %v2043_v42 }
 0xb7c   :  { %v2130_v27 = vmax.f32 %v2116_v44, 0.0 }
 0xb7d   :  { %v2129_v46 = vmax.f32 %v2111_v45, 0.0 }
 0xb7f   :  { %2744 = vmatprep.mubr.f32.mxu0 %v2129_v46 }
 0xb80   :  { %2745 = vmatmul.mubr.f32.vlgmr.msra.gmra.mrb[38].mxu0 %v2130_v27 }
 0xb81   :  { %v2711_v47 = vpop.f32.mrb[40].mxu1 }
 0xb82   :  { %v2126_v48 = vadd.f32 %v2711_v47, %v2043_v42  ;;  %v2120_v49 = vpop.f32.mrb[41].mxu1 }
 0xb83   :  { %v2121_v50 = vadd.f32 %v2120_v49, %v2043_v42 }
 0xb84   :  { %v2132_v60 = vmax.f32 %v2126_v48, 0.0 }
 0xb85   :  { %v2131_v53 = vmax.f32 %v2121_v50, 0.0 }
 0xb87   :  { %2747 = vmatprep.mubr.f32.mxu0 %v2131_v53 }
 0xb88   :  { %2748 = vmatmul.mubr.f32.gmra.mrb[40].mxu0 %v2132_v60 }
 0xb89   :  { %3191 = shalt.err (!%p3188_p4)
}
 0xb8a   :  { %s3192_s27 = scalar_lea.hbm %s3667_s10, 1024 }
 0xb8b   :  { %p3193_p5 = scmp.ne.s32.totalorder %s3667_s10, %s3192_s27  ;;  %p3196_p6 = scmp.lt.u32.totalorder %s3192_s27, %s3667_s10 }
 0xb8d   :  { %p3198_p7 = pnand %p3196_p6, %p3193_p5 }
 0xb8f   :  { %3201 = shalt.err (!%p3198_p7)
}
 0xb90   :  { %s3229_s16 = smov 512   ;;  %v2152_v25 = vsub.s32 2, %v3588_v52 }
 0xb91   :  { %2346 = dma.vmem_to_hbm [thread:$0]  %s2341_s20, 1024, %s3667_s10, [#allocation4], %s3229_s16, %s3229_s16, %s3225_s26  }
 0xb92   :  { %v2153_v61 = vrot.slane %v3593_v56, %v2152_v25 }
 0xc53   :  { %v2746_v15 = vpop.f32.mrb[38].mxu0 }
 0xc54   :  { %v2220_v17 = vpop.f32.mrb[39].mxu0 }
 0xc55   :  { %v2221_v54 = vadd.f32 %v2220_v17, %v2153_v61 }
 0xc57   :  { %v2425_v62 = vmul.f32 -1.442695, %v2221_v54 }
 0xc59   :  { %3018 = vpow2.f32 %v2425_v62 }
 0xc5b   :  { %v2749_v63 = vpop.f32.mrb[40].mxu0 }
 0xc5c   :  { %v2229_v57 = vpop.f32.mrb[41].mxu0 }
 0xc5d   :  { %v2230_v0 = vadd.f32 %v2229_v57, %v2153_v61 }
 0xc5f   :  { %v2426_v1 = vmul.f32 -1.442695, %v2230_v0 }
 0xc61   :  { %3020 = vpow2.f32 %v2426_v1 }
 0xc63   :  { %v3019_v2 = vpop.eup %3018 }
 0xc64   :  { %v2243_v3 = vadd.f32 1.0, %v3019_v2 }
 0xc66   :  { %3022 = vrcp.f32 %v2243_v3 }
 0xc6b   :  { %v3021_v4 = vpop.eup %3020 }
 0xc6c   :  { %v2244_v5 = vadd.f32 1.0, %v3021_v4 }
 0xc6e   :  { %3024 = vrcp.f32 %v2244_v5 }
 0xc70   :  { %v3023_v58 = vpop.eup %3022 }
 0xc71   :  { %2250 = vst [vmem:[%s3665_s8] sm:$0xff] %v3023_v58 }
 0xc78   :  { %v3025_v52 = vpop.eup %3024 }
 0xc79   :  { %2428 = vst [vmem:[%s3665_s8 + $0x8] sm:$0xff] %v3025_v52 }
 0xc7a   :  { %3210 = dma.done.wait [#allocation4], 1024  }
 0xc7b   :  { %3211 = vsyncadd [#allocation4], 4294966272 }
 0xc7c   :  { %2356 = vsyncpa [#allocation3], 1 }
 0xc7d   :  { %2357 = vsyncpa [#allocation6], 1 }
 0xc7e   :  { %2358 = vsyncpa [#allocation9], 1 }
 0xc7f   :  { %2359 = vsyncpa [#allocation12], 1 }
 0xc80   :  { %2360 = vsyncpa [#allocation4], 1 }

</bundles_post_ra>
